<compile_context>
chip_gen: v7x
topology: tpu7x:2x2x1
jax: 0.10.0
libtpu: 0.0.40
codegen_flags: <defaults>
</compile_context>

<pallas_src>
import jax
import jax.numpy as jnp
from jax.experimental import pallas as pl
from jax.experimental.pallas import tpu as pltpu

HID = 400          # hidden width from the PyTorch module
LAT = 20           # latent width from the PyTorch module
HIDP = 512         # HID padded to a multiple of 128 (lane-aligned)
LATP = 128         # LAT padded to one full vreg lane width


def _round_up(n: int, m: int) -> int:
    return ((n + m - 1) // m) * m


def vae_kernel(x_ref, eps_ref,
               w1_ref, b1_ref,
               wh_ref, bh_ref,
               w3_ref, b3_ref,
               w4_ref, b4_ref,
               recon_ref, mu_ref, logvar_ref):
    # Encoder: h1 = relu(x @ W1 + b1)  (bf16 MXU, f32 accumulation)
    x = x_ref[...]                                                # (TB, DP) bf16
    h1 = jnp.dot(x, w1_ref[...], preferred_element_type=jnp.float32)
    h1 = jnp.maximum(h1 + b1_ref[...], 0.0)                       # (TB, HIDP) f32

    # Fused fc21|fc22 head: one matmul -> [mu_pad | logvar_pad], split on a
    # 128-lane (vreg-aligned) boundary.
    head = jnp.dot(h1.astype(jnp.bfloat16), wh_ref[...],
                   preferred_element_type=jnp.float32) + bh_ref[...]
    mu = head[:, :LATP]                                           # (TB, 128) f32
    logvar = head[:, LATP:]                                       # (TB, 128) f32

    # Reparameterize in f32: z = mu + eps * exp(0.5*logvar).
    # Padded lanes: logvar==0, eps==0 -> z==0, and w3's padded rows are zero,
    # so padding never leaks into real outputs.
    z = mu + eps_ref[...] * jnp.exp(0.5 * logvar)

    # Decoder: h3 = relu(z @ W3 + b3); recon = sigmoid(h3 @ W4 + b4)
    h3 = jnp.dot(z.astype(jnp.bfloat16), w3_ref[...],
                 preferred_element_type=jnp.float32)
    h3 = jnp.maximum(h3 + b3_ref[...], 0.0)
    logits = jnp.dot(h3.astype(jnp.bfloat16), w4_ref[...],
                     preferred_element_type=jnp.float32) + b4_ref[...]

    recon_ref[...] = jax.nn.sigmoid(logits)
    mu_ref[...] = mu
    logvar_ref[...] = logvar


def init_params(key, input_dim):
    """nn.Linear-style init; weights stored transposed as (in, out), biases (1, out)."""
    ks = jax.random.split(key, 10)

    def lin(kw, kb, fan_in, fan_out):
        scale = 1.0 / jnp.sqrt(fan_in)
        w = jax.random.uniform(kw, (fan_in, fan_out), jnp.float32, -scale, scale)
        b = jax.random.uniform(kb, (1, fan_out), jnp.float32, -scale, scale)
        return w, b

    w1, b1 = lin(ks[0], ks[1], input_dim, HID)   # fc1
    w21, b21 = lin(ks[2], ks[3], HID, LAT)       # fc21
    w22, b22 = lin(ks[4], ks[5], HID, LAT)       # fc22
    w3, b3 = lin(ks[6], ks[7], LAT, HID)         # fc3
    w4, b4 = lin(ks[8], ks[9], HID, input_dim)   # fc4
    return (w1, b1, w21, b21, w22, b22, w3, b3, w4, b4)


def prepare_params(params, input_dim):
    """Fuse fc21/fc22, zero-pad every dim to a multiple of 128, cast weights bf16."""
    (w1, b1, w21, b21, w22, b22, w3, b3, w4, b4) = params
    dp = _round_up(input_dim, 128)

    w1p = jnp.zeros((dp, HIDP), jnp.float32).at[:input_dim, :HID].set(w1)
    b1p = jnp.zeros((1, HIDP), jnp.float32).at[:, :HID].set(b1)

    whp = jnp.zeros((HIDP, 2 * LATP), jnp.float32)
    whp = whp.at[:HID, :LAT].set(w21).at[:HID, LATP:LATP + LAT].set(w22)
    bhp = jnp.zeros((1, 2 * LATP), jnp.float32)
    bhp = bhp.at[:, :LAT].set(b21).at[:, LATP:LATP + LAT].set(b22)

    w3p = jnp.zeros((LATP, HIDP), jnp.float32).at[:LAT, :HID].set(w3)
    b3p = jnp.zeros((1, HIDP), jnp.float32).at[:, :HID].set(b3)

    w4p = jnp.zeros((HIDP, dp), jnp.float32).at[:HID, :input_dim].set(w4)
    b4p = jnp.zeros((1, dp), jnp.float32).at[:, :input_dim].set(b4)

    return (w1p.astype(jnp.bfloat16), b1p,
            whp.astype(jnp.bfloat16), bhp,
            w3p.astype(jnp.bfloat16), b3p,
            w4p.astype(jnp.bfloat16), b4p)


def vae_forward(x, eps, padded_params, input_dim, *, tb=None):
    """x: anything reshaping to (-1, input_dim). eps: (B, LAT) N(0,1) noise.
    Returns (recon (B, input_dim), mu (B, LAT), logvar (B, LAT))."""
    x2d = x.reshape(-1, input_dim)
    b = x2d.shape[0]
    dp = _round_up(input_dim, 128)

    if tb is None:
        # Big tiles amortize ~0.35us/step overhead; 1024 rows keeps the
        # double-buffered footprint well under v7x's 32 MiB scoped VMEM.
        tb = min(1024, _round_up(b, 8))
    b_pad = _round_up(b, tb)

    xp = jnp.zeros((b_pad, dp), jnp.bfloat16).at[:b, :input_dim].set(
        x2d.astype(jnp.bfloat16))
    epsp = jnp.zeros((b_pad, LATP), jnp.float32).at[:b, :LAT].set(
        eps.astype(jnp.float32))

    (w1p, b1p, whp, bhp, w3p, b3p, w4p, b4p) = padded_params

    grid = (b_pad // tb,)
    row = lambda i: (i, 0)      # batch-tiled arrays advance with the grid
    const = lambda i: (0, 0)    # weights/biases stay resident

    in_specs = [
        pl.BlockSpec((tb, dp), row),             # x tile
        pl.BlockSpec((tb, LATP), row),           # eps tile
        pl.BlockSpec((dp, HIDP), const),         # w1
        pl.BlockSpec((1, HIDP), const),          # b1
        pl.BlockSpec((HIDP, 2 * LATP), const),   # fused w21|w22
        pl.BlockSpec((1, 2 * LATP), const),      # fused b21|b22
        pl.BlockSpec((LATP, HIDP), const),       # w3
        pl.BlockSpec((1, HIDP), const),          # b3
        pl.BlockSpec((HIDP, dp), const),         # w4
        pl.BlockSpec((1, dp), const),            # b4
    ]
    out_specs = (
        pl.BlockSpec((tb, dp), row),             # recon (lane-dense, padded)
        pl.BlockSpec((tb, LATP), row),           # mu (lane-dense, padded)
        pl.BlockSpec((tb, LATP), row),           # logvar
    )
    out_shapes = (
        jax.ShapeDtypeStruct((b_pad, dp), jnp.float32),
        jax.ShapeDtypeStruct((b_pad, LATP), jnp.float32),
        jax.ShapeDtypeStruct((b_pad, LATP), jnp.float32),
    )

    mxu_terms = dp * HIDP + HIDP * 2 * LATP + LATP * HIDP + HIDP * dp
    weight_bytes = 2 * mxu_terms + 4 * (HIDP + 2 * LATP + HIDP + dp)
    act_bytes = b_pad * (2 * dp + 4 * LATP) + 4 * b_pad * (dp + 2 * LATP)
    cost = pl.CostEstimate(
        flops=2 * b_pad * mxu_terms,
        transcendentals=b_pad * (LATP + dp),
        bytes_accessed=weight_bytes + act_bytes,
    )

    recon_p, mu_p, lv_p = pl.pallas_call(
        vae_kernel,
        out_shape=out_shapes,
        grid=grid,
        in_specs=in_specs,
        out_specs=out_specs,
        compiler_params=pltpu.CompilerParams(
            dimension_semantics=("parallel",)),   # 2x on v7x (2 TCs); no-op v5e/v6e
        cost_estimate=cost,
    )(xp, epsp, w1p, b1p, whp, bhp, w3p, b3p, w4p, b4p)

    return (recon_p[:b, :input_dim], mu_p[:b, :LAT], lv_p[:b, :LAT])


def vae_reference(x, eps, params, input_dim):
    """Pure-JAX reference emulating the kernel's bf16-weight / f32-acc numerics."""
    x2d = x.reshape(-1, input_dim).astype(jnp.float32)
    (w1, b1, w21, b21, w22, b22, w3, b3, w4, b4) = params

    def mm(a, w):
        return jnp.dot(a.astype(jnp.bfloat16), w.astype(jnp.bfloat16),
                       preferred_element_type=jnp.float32)

    h1 = jnp.maximum(mm(x2d, w1) + b1, 0.0)
    mu = mm(h1, w21) + b21
    logvar = mm(h1, w22) + b22
    z = mu + eps * jnp.exp(0.5 * logvar)
    h3 = jnp.maximum(mm(z, w3) + b3, 0.0)
    recon = jax.nn.sigmoid(mm(h3, w4) + b4)
    return recon, mu, logvar


if __name__ == "__main__":
    INPUT_DIM = 64           # e.g. a (1, 8, 8) "image" flattened
    key = jax.random.PRNGKey(0)
    k_x, k_eps, k_p = jax.random.split(key, 3)

    # NCHW-style input; flattened to (-1, input_dim) inside vae_forward.
    x = jax.random.normal(k_x, (16, 1, 8, 8), dtype=jnp.float32)
    B = x.size // INPUT_DIM
    # torch.randn_like(std) has no in-kernel equivalent with a fixed torch seed;
    # the noise is supplied explicitly (standard JAX practice).
    eps = jax.random.normal(k_eps, (B, LAT), dtype=jnp.float32)

    params = init_params(k_p, INPUT_DIM)
    padded = prepare_params(params, INPUT_DIM)

    # tb=8 -> multi-step grid even at this tiny test batch (exercises pipelining).
    recon, mu, logvar = vae_forward(x, eps, padded, INPUT_DIM, tb=8)
    jax.block_until_ready((recon, mu, logvar))

    r_ref, mu_r, lv_r = vae_reference(x, eps, params, INPUT_DIM)
    assert recon.shape == (B, INPUT_DIM)
    assert mu.shape == (B, LAT) and logvar.shape == (B, LAT)
    # bf16 matmuls => loosened tolerances vs. the f32 original.
    assert jnp.allclose(recon, r_ref, atol=2e-2, rtol=2e-2)
    assert jnp.allclose(mu, mu_r, atol=2e-2, rtol=2e-2)
    assert jnp.allclose(logvar, lv_r, atol=2e-2, rtol=2e-2)

    print("KERNEL_OK")
</pallas_src>

<mosaic_0001>
module attributes {stable_mosaic.version = 11 : i64} {
  func.func @vae_kernel(%arg0: i32, %arg1: memref<8x128xbf16, #tpu.memory_space<vmem>>, %arg2: memref<8x128xf32, #tpu.memory_space<vmem>>, %arg3: memref<128x512xbf16, #tpu.memory_space<vmem>>, %arg4: memref<1x512xf32, #tpu.memory_space<vmem>>, %arg5: memref<512x256xbf16, #tpu.memory_space<vmem>>, %arg6: memref<1x256xf32, #tpu.memory_space<vmem>>, %arg7: memref<128x512xbf16, #tpu.memory_space<vmem>>, %arg8: memref<1x512xf32, #tpu.memory_space<vmem>>, %arg9: memref<512x128xbf16, #tpu.memory_space<vmem>>, %arg10: memref<1x128xf32, #tpu.memory_space<vmem>>, %arg11: memref<8x128xf32, #tpu.memory_space<vmem>>, %arg12: memref<8x128xf32, #tpu.memory_space<vmem>>, %arg13: memref<8x128xf32, #tpu.memory_space<vmem>>) attributes {dimension_semantics = [#tpu.dimension_semantics<parallel>], iteration_bounds = array<i64: 2>, scalar_prefetch = 0 : i64, scratch_operands = 0 : i64, tpu.core_type = #tpu.core_type<tc>, window_params = [{transform_indices = @transform_0, window_bounds = array<i64: 8, 128>}, {transform_indices = @transform_1, window_bounds = array<i64: 8, 128>}, {pipeline_mode = #tpu.pipeline_mode<synchronous>, transform_indices = @transform_2, window_bounds = array<i64: 128, 512>}, {pipeline_mode = #tpu.pipeline_mode<synchronous>, transform_indices = @transform_3, window_bounds = array<i64: 1, 512>}, {pipeline_mode = #tpu.pipeline_mode<synchronous>, transform_indices = @transform_4, window_bounds = array<i64: 512, 256>}, {pipeline_mode = #tpu.pipeline_mode<synchronous>, transform_indices = @transform_5, window_bounds = array<i64: 1, 256>}, {pipeline_mode = #tpu.pipeline_mode<synchronous>, transform_indices = @transform_6, window_bounds = array<i64: 128, 512>}, {pipeline_mode = #tpu.pipeline_mode<synchronous>, transform_indices = @transform_7, window_bounds = array<i64: 1, 512>}, {pipeline_mode = #tpu.pipeline_mode<synchronous>, transform_indices = @transform_8, window_bounds = array<i64: 512, 128>}, {pipeline_mode = #tpu.pipeline_mode<synchronous>, transform_indices = @transform_9, window_bounds = array<i64: 1, 128>}, {transform_indices = @transform_10, window_bounds = array<i64: 8, 128>}, {transform_indices = @transform_11, window_bounds = array<i64: 8, 128>}, {transform_indices = @transform_12, window_bounds = array<i64: 8, 128>}]} {
    %c0 = arith.constant 0 : index
    %c0_0 = arith.constant 0 : index
    %0 = vector.load %arg1[%c0, %c0_0] : memref<8x128xbf16, #tpu.memory_space<vmem>>, vector<8x128xbf16>
    %c0_1 = arith.constant 0 : index
    %c0_2 = arith.constant 0 : index
    %1 = vector.load %arg3[%c0_1, %c0_2] : memref<128x512xbf16, #tpu.memory_space<vmem>>, vector<128x512xbf16>
    %cst = arith.constant dense<0.000000e+00> : vector<8x512xf32>
    %2 = tpu.matmul %0, %1, %cst {dimension_numbers = #tpu.dot_dimension_numbers<[1], [0], [0], [1], [0, 0, 1, 1], [], []>} : vector<8x128xbf16>, vector<128x512xbf16>, vector<8x512xf32> -> vector<8x512xf32>
    %c0_3 = arith.constant 0 : index
    %c0_4 = arith.constant 0 : index
    %3 = vector.load %arg4[%c0_3, %c0_4] : memref<1x512xf32, #tpu.memory_space<vmem>>, vector<1x512xf32>
    %4 = vector.broadcast %3 : vector<1x512xf32> to vector<8x512xf32>
    %5 = arith.addf %2, %4 : vector<8x512xf32>
    %cst_5 = arith.constant 0.000000e+00 : f32
    %6 = vector.broadcast %cst_5 : f32 to vector<8x512xf32>
    %7 = arith.maximumf %5, %6 : vector<8x512xf32>
    %8 = arith.truncf %7 : vector<8x512xf32> to vector<8x512xbf16>
    %c0_6 = arith.constant 0 : index
    %c0_7 = arith.constant 0 : index
    %9 = vector.load %arg5[%c0_6, %c0_7] : memref<512x256xbf16, #tpu.memory_space<vmem>>, vector<512x256xbf16>
    %cst_8 = arith.constant dense<0.000000e+00> : vector<8x256xf32>
    %10 = tpu.matmul %8, %9, %cst_8 {dimension_numbers = #tpu.dot_dimension_numbers<[1], [0], [0], [1], [0, 0, 1, 1], [], []>} : vector<8x512xbf16>, vector<512x256xbf16>, vector<8x256xf32> -> vector<8x256xf32>
    %c0_9 = arith.constant 0 : index
    %c0_10 = arith.constant 0 : index
    %11 = vector.load %arg6[%c0_9, %c0_10] : memref<1x256xf32, #tpu.memory_space<vmem>>, vector<1x256xf32>
    %12 = vector.broadcast %11 : vector<1x256xf32> to vector<8x256xf32>
    %13 = arith.addf %10, %12 : vector<8x256xf32>
    %14 = vector.extract_strided_slice %13 {offsets = [0, 0], sizes = [8, 128], strides = [1, 1]} : vector<8x256xf32> to vector<8x128xf32>
    %15 = vector.extract_strided_slice %13 {offsets = [0, 128], sizes = [8, 128], strides = [1, 1]} : vector<8x256xf32> to vector<8x128xf32>
    %c0_11 = arith.constant 0 : index
    %c0_12 = arith.constant 0 : index
    %16 = vector.load %arg2[%c0_11, %c0_12] : memref<8x128xf32, #tpu.memory_space<vmem>>, vector<8x128xf32>
    %cst_13 = arith.constant 5.000000e-01 : f32
    %17 = vector.broadcast %cst_13 : f32 to vector<8x128xf32>
    %18 = arith.mulf %17, %15 : vector<8x128xf32>
    %19 = math.exp %18 : vector<8x128xf32>
    %20 = arith.mulf %16, %19 : vector<8x128xf32>
    %21 = arith.addf %14, %20 : vector<8x128xf32>
    %22 = arith.truncf %21 : vector<8x128xf32> to vector<8x128xbf16>
    %c0_14 = arith.constant 0 : index
    %c0_15 = arith.constant 0 : index
    %23 = vector.load %arg7[%c0_14, %c0_15] : memref<128x512xbf16, #tpu.memory_space<vmem>>, vector<128x512xbf16>
    %cst_16 = arith.constant dense<0.000000e+00> : vector<8x512xf32>
    %24 = tpu.matmul %22, %23, %cst_16 {dimension_numbers = #tpu.dot_dimension_numbers<[1], [0], [0], [1], [0, 0, 1, 1], [], []>} : vector<8x128xbf16>, vector<128x512xbf16>, vector<8x512xf32> -> vector<8x512xf32>
    %c0_17 = arith.constant 0 : index
    %c0_18 = arith.constant 0 : index
    %25 = vector.load %arg8[%c0_17, %c0_18] : memref<1x512xf32, #tpu.memory_space<vmem>>, vector<1x512xf32>
    %26 = vector.broadcast %25 : vector<1x512xf32> to vector<8x512xf32>
    %27 = arith.addf %24, %26 : vector<8x512xf32>
    %cst_19 = arith.constant 0.000000e+00 : f32
    %28 = vector.broadcast %cst_19 : f32 to vector<8x512xf32>
    %29 = arith.maximumf %27, %28 : vector<8x512xf32>
    %30 = arith.truncf %29 : vector<8x512xf32> to vector<8x512xbf16>
    %c0_20 = arith.constant 0 : index
    %c0_21 = arith.constant 0 : index
    %31 = vector.load %arg9[%c0_20, %c0_21] : memref<512x128xbf16, #tpu.memory_space<vmem>>, vector<512x128xbf16>
    %cst_22 = arith.constant dense<0.000000e+00> : vector<8x128xf32>
    %32 = tpu.matmul %30, %31, %cst_22 {dimension_numbers = #tpu.dot_dimension_numbers<[1], [0], [0], [1], [0, 0, 1, 1], [], []>} : vector<8x512xbf16>, vector<512x128xbf16>, vector<8x128xf32> -> vector<8x128xf32>
    %c0_23 = arith.constant 0 : index
    %c0_24 = arith.constant 0 : index
    %33 = vector.load %arg10[%c0_23, %c0_24] : memref<1x128xf32, #tpu.memory_space<vmem>>, vector<1x128xf32>
    %34 = vector.broadcast %33 : vector<1x128xf32> to vector<8x128xf32>
    %35 = arith.addf %32, %34 : vector<8x128xf32>
    %36 = arith.negf %35 : vector<8x128xf32>
    %37 = math.exp %36 : vector<8x128xf32>
    %cst_25 = arith.constant 1.000000e+00 : f32
    %38 = vector.broadcast %cst_25 : f32 to vector<8x128xf32>
    %39 = arith.addf %38, %37 : vector<8x128xf32>
    %40 = arith.divf %38, %39 : vector<8x128xf32>
    %c0_26 = arith.constant 0 : index
    %c0_27 = arith.constant 0 : index
    %41 = vector.load %arg11[%c0_26, %c0_27] : memref<8x128xf32, #tpu.memory_space<vmem>>, vector<8x128xf32>
    tpu.vector_store %arg11[%c0_26, %c0_27], %40 {strides = array<i32>} : memref<8x128xf32, #tpu.memory_space<vmem>>, vector<8x128xf32>,
    %c0_28 = arith.constant 0 : index
    %c0_29 = arith.constant 0 : index
    %42 = vector.load %arg12[%c0_28, %c0_29] : memref<8x128xf32, #tpu.memory_space<vmem>>, vector<8x128xf32>
    tpu.vector_store %arg12[%c0_28, %c0_29], %14 {strides = array<i32>} : memref<8x128xf32, #tpu.memory_space<vmem>>, vector<8x128xf32>,
    %c0_30 = arith.constant 0 : index
    %c0_31 = arith.constant 0 : index
    %43 = vector.load %arg13[%c0_30, %c0_31] : memref<8x128xf32, #tpu.memory_space<vmem>>, vector<8x128xf32>
    tpu.vector_store %arg13[%c0_30, %c0_31], %15 {strides = array<i32>} : memref<8x128xf32, #tpu.memory_space<vmem>>, vector<8x128xf32>,
    return
  }
  func.func @transform_0(%arg0: i32) -> (i32, i32) {
    %c0_i32 = arith.constant 0 : i32
    %c0_i32_0 = arith.constant 0 : i32
    return %arg0, %c0_i32 : i32, i32
  }
  func.func @transform_1(%arg0: i32) -> (i32, i32) {
    %c0_i32 = arith.constant 0 : i32
    %c0_i32_0 = arith.constant 0 : i32
    return %arg0, %c0_i32 : i32, i32
  }
  func.func @transform_2(%arg0: i32) -> (i32, i32) {
    %c0_i32 = arith.constant 0 : i32
    %c0_i32_0 = arith.constant 0 : i32
    %c0_i32_1 = arith.constant 0 : i32
    return %c0_i32, %c0_i32_0 : i32, i32
  }
  func.func @transform_3(%arg0: i32) -> (i32, i32) {
    %c0_i32 = arith.constant 0 : i32
    %c0_i32_0 = arith.constant 0 : i32
    %c0_i32_1 = arith.constant 0 : i32
    return %c0_i32, %c0_i32_0 : i32, i32
  }
  func.func @transform_4(%arg0: i32) -> (i32, i32) {
    %c0_i32 = arith.constant 0 : i32
    %c0_i32_0 = arith.constant 0 : i32
    %c0_i32_1 = arith.constant 0 : i32
    return %c0_i32, %c0_i32_0 : i32, i32
  }
  func.func @transform_5(%arg0: i32) -> (i32, i32) {
    %c0_i32 = arith.constant 0 : i32
    %c0_i32_0 = arith.constant 0 : i32
    %c0_i32_1 = arith.constant 0 : i32
    return %c0_i32, %c0_i32_0 : i32, i32
  }
  func.func @transform_6(%arg0: i32) -> (i32, i32) {
    %c0_i32 = arith.constant 0 : i32
    %c0_i32_0 = arith.constant 0 : i32
    %c0_i32_1 = arith.constant 0 : i32
    return %c0_i32, %c0_i32_0 : i32, i32
  }
  func.func @transform_7(%arg0: i32) -> (i32, i32) {
    %c0_i32 = arith.constant 0 : i32
    %c0_i32_0 = arith.constant 0 : i32
    %c0_i32_1 = arith.constant 0 : i32
    return %c0_i32, %c0_i32_0 : i32, i32
  }
  func.func @transform_8(%arg0: i32) -> (i32, i32) {
    %c0_i32 = arith.constant 0 : i32
    %c0_i32_0 = arith.constant 0 : i32
    %c0_i32_1 = arith.constant 0 : i32
    return %c0_i32, %c0_i32_0 : i32, i32
  }
  func.func @transform_9(%arg0: i32) -> (i32, i32) {
    %c0_i32 = arith.constant 0 : i32
    %c0_i32_0 = arith.constant 0 : i32
    %c0_i32_1 = arith.constant 0 : i32
    return %c0_i32, %c0_i32_0 : i32, i32
  }
  func.func @transform_10(%arg0: i32) -> (i32, i32) {
    %c0_i32 = arith.constant 0 : i32
    %c0_i32_0 = arith.constant 0 : i32
    return %arg0, %c0_i32 : i32, i32
  }
  func.func @transform_11(%arg0: i32) -> (i32, i32) {
    %c0_i32 = arith.constant 0 : i32
    %c0_i32_0 = arith.constant 0 : i32
    return %arg0, %c0_i32 : i32, i32
  }
  func.func @transform_12(%arg0: i32) -> (i32, i32) {
    %c0_i32 = arith.constant 0 : i32
    %c0_i32_0 = arith.constant 0 : i32
    return %arg0, %c0_i32 : i32, i32
  }
}

</mosaic_0001>

<bundles_post_ra>
// kernel: tpu_custom_call.1
= control target key start
LH: loop header
LB: loop body
LE: loop exit
PB: predicated region body
PF: predicated region fallthrough
CT: control target
= control target key end

     0   :  { %s3654_s0 = inlined_call_operand.hbm [shape: bf16[16,128], index: 0, kind: input, shape index: {}]   ;;  %s3655_s1 = inlined_call_operand.hbm [shape: f32[16,128], index: 1, kind: input, shape index: {}]   ;;  %s3656_s2 = inlined_call_operand.hbm [shape: bf16[128,512], index: 2, kind: input, shape index: {}]   ;;  %s3657_s3 = inlined_call_operand.vmem [shape: f32[1,512], index: 3, kind: input, shape index: {}]   ;;  %s3658_s4 = inlined_call_operand.hbm [shape: bf16[512,256], index: 4, kind: input, shape index: {}]   ;;  %s3659_s5 = inlined_call_operand.vmem [shape: f32[1,256], index: 5, kind: input, shape index: {}]   ;;  %s3660_s6 = inlined_call_operand.hbm [shape: bf16[128,512], index: 6, kind: input, shape index: {}]   ;;  %s3661_s7 = inlined_call_operand.vmem [shape: f32[1,512], index: 7, kind: input, shape index: {}]   ;;  %s3662_s8 = inlined_call_operand.hbm [shape: bf16[512,128], index: 8, kind: input, shape index: {}]   ;;  %s3663_s9 = inlined_call_operand.vmem [shape: f32[1,128], index: 9, kind: input, shape index: {}]   ;;  %s3664_s10 = inlined_call_operand.hbm [shape: f32[16,128], index: 10, kind: output, shape index: {0}]   ;;  %s3665_s11 = inlined_call_operand.hbm [shape: f32[16,128], index: 11, kind: output, shape index: {1}]   ;;  %s3666_s12 = inlined_call_operand.hbm [shape: f32[16,128], index: 12, kind: output, shape index: {2}]  }
   0x1   :  { %3676 = sst [smem:[#allocation24_spill]] %s3654_s0 }
   0x2   :  { %3677 = sst [smem:[#allocation25_spill]] %s3656_s2 }
   0x3   :  { %3678 = sst [smem:[#allocation26_spill]] %s3658_s4 }
   0x4   :  { %3679 = sst [smem:[#allocation27_spill]] %s3660_s6 }
   0x5   :  { %3680 = sst [smem:[#allocation28_spill]] %s3663_s9 }
   0x6   :  { %3681 = sst [smem:[#allocation29_spill]] %s3664_s10 }
   0x7   :  { %3682 = sst [smem:[#allocation30_spill]] %s3665_s11 }
   0x8   :  { %3683 = sst [smem:[#allocation31_spill]] %s3666_s12 }
   0x9   :  { %18 = vsyncpa [#allocation3], 0 }
   0xa   :  { %20 = vsyncpa [#allocation3 + $0x1], 0 }
   0xb   :  { %21 = vsyncpa [#allocation6], 0 }
   0xc   :  { %23 = vsyncpa [#allocation6 + $0x1], 0 }
   0xd   :  { %24 = vsyncpa [#allocation9], 0 }
   0xe   :  { %25 = vsyncpa [#allocation12], 0 }
   0xf   :  { %26 = vsyncpa [#allocation4], 0 }
  0x10   :  { %28 = vsyncpa [#allocation4 + $0x1], 0 }
  0x11   :  { %29 = vsyncpa [#allocation15], 0 }
  0x12   :  { %31 = vsyncpa [#allocation15 + $0x1], 0  ;;  %s3208_s21 = smov 0   ;;  %s3210_s22 = smov 0  }
  0x13   :  { %s3212_s23 = smov 0   ;;  %s3214_s24 = smov 0  }
  0x14 LB: > { %s3127_s25 = smov [#allocation7]   ;;  %s3229_s27 = sadd.s32 4294967295, %s3125_s24   ;;  %s3125_s24 = sphi %s3214_s24, %s3718_s24   ;;  %s3121_s23 = sphi %s3212_s23, %s3717_s23   ;;  %s3117_s22 = sphi %s3210_s22, %s3716_s22   ;;  %s3113_s21 = sphi %s3208_s21, %s3715_s21  }
  0x15   : > { %s352_s26 = sshll.u32 %s3127_s25, 4  ;;  %p2232_p0 = scmp.ge.s32.totalorder %s3125_s24, 1  ;;  %s3234_s26 = int_to_ptr.vmem [resolvable:$true] %s352_s26 }
  0x16   : > { %p3671_p1 = scmp.eq.s32.totalorder %s3229_s27, 0  ;;  %p340_p2 = scmp.lt.s32.totalorder %s3125_s24, 3 }
  0x17   : > { %s3128_s29 = smov [#allocation8]   ;;  %s3129_s14 = smov [#allocation10]  }
  0x18   : > { %p3236_p3 = pnand %p2232_p0, %p340_p2  ;;  %s368_s30 = sshll.u32 %s3128_s29, 4  ;;  %s3249_s30 = int_to_ptr.vmem [resolvable:$true] %s368_s30 }
  0x19   : > { %s3251_s15 = sshll.u32 %s3129_s14, 4  ;;  %s3686_s2 = sld [smem:[#allocation25_spill]]  ;;  %s385_s15 = int_to_ptr.vmem [resolvable:$true] %s3251_s15 }
  0x1a   : > { %s3684_s28 = scalar_select %p3236_p3, 1, 0 }
  0x1b   : > { %p2498_p5 = pneg %p3236_p3 }
  0x1d   : > { %p3245_p6 = pnand %p2498_p5, %p3671_p1 }
  0x1f   : > { %s2811_s18 = scalar_lea.hbm %s3686_s2, 4096  ;;  %p3261_p8 = pneg %p3245_p6 }
  0x20   : > { %p2812_p7 = scmp.ne.s32.totalorder %s3686_s2, %s2811_s18  ;;  %p2818_p11 = scmp.lt.u32.totalorder %s2811_s18, %s3686_s2 }
  0x22   : > { %p2814_p9 = pnand %p3261_p8, %p2812_p7 }
  0x24   : > { %p2815_p10 = pneg %p2814_p9 }
  0x26   : > { %p2820_p12 = pnand %p2818_p11, %p2815_p10 }
  0x28   : > { %2823 = shalt.err (!%p2820_p12)
}
  0x29   : > { %s2824_s16 = scalar_lea.vmem %s3234_s26, 4096  ;;  %p2832_p5 = scmp.lt.s32.totalorder %s3234_s26, %s3234_s26 }
  0x2a   : > { %p2825_p13 = scmp.ne.s32.totalorder %s3234_s26, %s2824_s16  ;;  %p2833_p4 = scmp.lt.s32.totalorder %s2824_s16, %s2824_s16 }
  0x2c   : > { %p2827_p0 = pnand %p2825_p13, %p3261_p8  ;;  %p2834_p7 = por %p2833_p4, %p2832_p5 }
  0x2e   : > { %p2828_p2 = pneg %p2827_p0 }
  0x30   : > { %p2835_p9 = pnand %p2834_p7, %p2828_p2 }
  0x32   : > { %2838 = shalt.err (!%p2835_p9)
}
  0x33   : > { %s3670_s17 = smov 256   ;;  %s3131_s18 = smov 16  }
  0x34   : > { %2501 = dma.hbm_to_vmem [thread:$0]  (!%p3245_p6), %s3686_s2, 4096, %s3234_s26, [#allocation6], %s3670_s17, %s3670_s17, %s3131_s18  }
  0x35   : > { %s3688_s4 = sld [smem:[#allocation26_spill]] }
  0x3b   : > { %s2839_s16 = scalar_lea.hbm %s3688_s4, 8192 }
  0x3c   : > { %p2840_p4 = scmp.ne.s32.totalorder %s3688_s4, %s2839_s16  ;;  %p2846_p12 = scmp.lt.u32.totalorder %s2839_s16, %s3688_s4 }
  0x3e   : > { %p2842_p10 = pnand %p2840_p4, %p3261_p8 }
  0x40   : > { %p2843_p11 = pneg %p2842_p10 }
  0x42   : > { %p2848_p13 = pnand %p2846_p12, %p2843_p11 }
  0x44   : > { %2851 = shalt.err (!%p2848_p13)
}
  0x45   : > { %s2852_s26 = scalar_lea.vmem %s3249_s30, 8192  ;;  %p2860_p7 = scmp.lt.s32.totalorder %s3249_s30, %s3249_s30 }
  0x46   : > { %p2853_p0 = scmp.ne.s32.totalorder %s3249_s30, %s2852_s26  ;;  %p2861_p9 = scmp.lt.s32.totalorder %s2852_s26, %s2852_s26 }
  0x48   : > { %p2855_p2 = pnand %p2853_p0, %p3261_p8  ;;  %p2862_p4 = por %p2861_p9, %p2860_p7 }
  0x4a   : > { %p2856_p5 = pneg %p2855_p2 }
  0x4c   : > { %p2863_p10 = pnand %p2862_p4, %p2856_p5 }
  0x4e   : > { %2866 = shalt.err (!%p2863_p10)
}
  0x4f   : > { %s3132_s9 = smov 128   ;;  %s3133_s10 = smov 8  }
  0x50   : > { %2504 = dma.hbm_to_vmem [thread:$0]  (!%p3245_p6), %s3688_s4, 8192, %s3249_s30, [#allocation9], %s3132_s9, %s3132_s9, %s3133_s10  }
  0x51   : > { %s3689_s6 = sld [smem:[#allocation27_spill]] }
  0x57   : > { %s2867_s29 = scalar_lea.hbm %s3689_s6, 4096 }
  0x58   : > { %p2868_p11 = scmp.ne.s32.totalorder %s3689_s6, %s2867_s29  ;;  %p2874_p0 = scmp.lt.u32.totalorder %s2867_s29, %s3689_s6 }
  0x5a   : > { %p2870_p12 = pnand %p2868_p11, %p3261_p8 }
  0x5c   : > { %p2871_p13 = pneg %p2870_p12 }
  0x5e   : > { %p2876_p2 = pnand %p2874_p0, %p2871_p13 }
  0x60   : > { %2879 = shalt.err (!%p2876_p2)
}
  0x61   : > { %s2880_s11 = scalar_lea.vmem %s385_s15, 4096  ;;  %p2888_p4 = scmp.lt.s32.totalorder %s385_s15, %s385_s15 }
  0x62   : > { %p2881_p5 = scmp.ne.s32.totalorder %s385_s15, %s2880_s11  ;;  %p2889_p10 = scmp.lt.s32.totalorder %s2880_s11, %s2880_s11 }
  0x64   : > { %p2883_p7 = pnand %p2881_p5, %p3261_p8  ;;  %p2890_p1 = por %p2889_p10, %p2888_p4 }
  0x66   : > { %p2884_p9 = pneg %p2883_p7 }
  0x68   : > { %p2891_p3 = pnand %p2890_p1, %p2884_p9 }
  0x6a   : > { %2894 = shalt.err (!%p2891_p3)
}
  0x6b   : > { %s3690_s30 = smov 256   ;;  %s3134_s10 = smov [#allocation11]  }
  0x6c   : > { %2507 = dma.hbm_to_vmem [thread:$0]  (!%p3245_p6), %s3689_s6, 4096, %s385_s15, [#allocation9], %s3690_s30, %s3690_s30, %s3131_s18  }
  0x6d   : > { %s400_s12 = sshll.u32 %s3134_s10, 4  ;;  %s2895_s29 = scalar_lea.hbm %s3662_s8, 4096  ;;  %s401_s12 = int_to_ptr.vmem [resolvable:$true] %s400_s12 }
  0x6e   : > { %p2896_p1 = scmp.ne.s32.totalorder %s3662_s8, %s2895_s29  ;;  %p2902_p12 = scmp.lt.u32.totalorder %s2895_s29, %s3662_s8 }
  0x70   : > { %p2898_p3 = pnand %p2896_p1, %p3261_p8 }
  0x72   : > { %p2899_p11 = pneg %p2898_p3 }
  0x74   : > { %p2904_p13 = pnand %p2902_p12, %p2899_p11 }
  0x76   : > { %2907 = shalt.err (!%p2904_p13)
}
  0x77   : > { %s2908_s15 = scalar_lea.vmem %s401_s12, 4096  ;;  %p2916_p7 = scmp.lt.s32.totalorder %s401_s12, %s401_s12 }
  0x78   : > { %p2909_p0 = scmp.ne.s32.totalorder %s401_s12, %s2908_s15  ;;  %p2917_p9 = scmp.lt.s32.totalorder %s2908_s15, %s2908_s15 }
  0x7a   : > { %p2911_p2 = pnand %p2909_p0, %p3261_p8  ;;  %p2918_p4 = por %p2917_p9, %p2916_p7 }
  0x7c   : > { %p2912_p5 = pneg %p2911_p2 }
  0x7e   : > { %p2919_p10 = pnand %p2918_p4, %p2912_p5 }
  0x80   : > { %2922 = shalt.err (!%p2919_p10)
}
  0x81   : > { %s3135_s18 = smov 64   ;;  %s3136_s25 = smov 4  }
  0x82   : > { %2510 = dma.hbm_to_vmem [thread:$0]  (!%p3245_p6), %s3662_s8, 4096, %s401_s12, [#allocation12], %s3135_s18, %s3135_s18, %s3136_s25  }
  0x83   : > { %s3673_s9 = sadd.s32 4294967294, %s3125_s24   ;;  %s3350_s10 = sadd.s32 1, %s3125_s24  }
  0x84   : > { %s41_s19 = ssub.s32 %s3125_s24, %s3350_s10  ;;  %s44_s20 = sadd.s32 1, %s3121_s23 }
  0x85   : > { %p42_p8 = scmp.eq.s32.totalorder %s41_s19, 0  ;;  %p51_p1 = scmp.ne.s32.totalorder %s3121_s23, %s3117_s22 }
  0x86   : > { %p52_p3 = scmp.eq.s32.totalorder %s3125_s24, 0  ;;  %p57_p11 = scmp.ne.s32.totalorder %s3117_s22, %s3113_s21 }
  0x87   : > { %s3361_s29 = scalar_select %p42_p8, %s3121_s23, %s44_s20  }
  0x88   : > { %p3363_p12 = por %p52_p3, %p51_p1  ;;  %p3692_p13 = scmp.eq.s32.totalorder %s3229_s27, 0 }
  0x89   : > { %p275_p0 = scmp.eq.s32.totalorder %s3229_s27, 1  ;;  %p281_p2 = scmp.eq.s32.totalorder %s3673_s9, 1 }
  0x8a   : > { %p3369_p6 = por %p3692_p13, %p57_p11  ;;  %p2532_p5 = scmp.lt.s32.totalorder %s3125_s24, 2 }
  0x8b   : > { %s3378_s14 = sand.u32 1, %s3121_s23   ;;  %p3380_p7 = por %p275_p0, %p51_p1 }
  0x8c   : > { %s3693_s12 = scalar_select %p3369_p6, 1, 0 }
  0x8d   : > { %s3694_s16 = scalar_select %p3380_p7, 1, 0 }
  0x8e   : > { %p3384_p9 = por %p281_p2, %p57_p11  ;;  %s2238_s11 = sshll.u32 %s3378_s14, 2 }
  0x8f   : > { %s2239_s15 = sshll.u32 %s3125_s24, 6  ;;  %s3696_s0 = sld [smem:[#allocation24_spill]] }
  0x90   : > { %s3695_s26 = scalar_select %p3384_p9, 1, 0 }
  0x91   : > { %s421_s17 = scalar_lea.vmem [#allocation2], %s2238_s11  ;;  %p3399_p4 = pnand %p2532_p5, %p3363_p12 }
  0x92   : > { %s428_s19 = sshll.u32 %s421_s17, 4  ;;  %s2240_s2 = sshll.u32 %s3378_s14, 3  ;;  %s3395_s19 = int_to_ptr.vmem [resolvable:$true] %s428_s19 }
  0x93   : > { %s418_s18 = scalar_lea.sflag [#allocation3], %s3378_s14  ;;  %p2925_p8 = pneg %p3399_p4 }
  0x95   : > { %s3393_s30 = scalar_lea.hbm %s3696_s0, %s2239_s15  ;;  %s2928_s13 = scalar_lea.hbm %s3696_s0, 128 }
  0x96   : > { %s2923_s15 = scalar_lea.hbm %s3393_s30, 64  ;;  %p2929_p11 = scmp.lt.u32.totalorder %s3393_s30, %s3696_s0 }
  0x97   : > { %p2924_p10 = scmp.ne.s32.totalorder %s3393_s30, %s2923_s15  ;;  %p2930_p12 = scmp.lt.u32.totalorder %s2928_s13, %s2923_s15 }
  0x98   : > { %p2932_p0 = scmp.lt.u32.totalorder %s2923_s15, %s3393_s30 }
  0x99   : > { %p2926_p1 = pnand %p2925_p8, %p2924_p10  ;;  %p2931_p13 = por %p2930_p12, %p2929_p11 }
  0x9b   : > { %p2927_p3 = pneg %p2926_p1  ;;  %p2933_p2 = por %p2932_p0, %p2931_p13 }
  0x9d   : > { %p2934_p5 = pnand %p2933_p2, %p2927_p3 }
  0x9f   : > { %2937 = shalt.err (!%p2934_p5)
}
  0xa0   : > { %s2938_s9 = scalar_lea.vmem %s3395_s19, 64  ;;  %s3137_s11 = smov [#allocation2]  }
  0xa1   : > { %p2939_p10 = scmp.ne.s32.totalorder %s3395_s19, %s2938_s9  ;;  %s2943_s25 = sshll.u32 %s3137_s11, 4  ;;  %s2944_s25 = int_to_ptr.vmem [resolvable:$false] %s2943_s25 }
  0xa2   : > { %s2945_s4 = scalar_lea.vmem %s2944_s25, 128  ;;  %p2946_p7 = scmp.lt.s32.totalorder %s3395_s19, %s2944_s25 }
  0xa3   : > { %p2941_p1 = pnand %p2939_p10, %p2925_p8  ;;  %p2947_p11 = scmp.lt.s32.totalorder %s2945_s4, %s2938_s9 }
  0xa5   : > { %p2942_p9 = pneg %p2941_p1  ;;  %p2948_p12 = por %p2947_p11, %p2946_p7 }
  0xa7   : > { %p2949_p13 = pnand %p2948_p12, %p2942_p9 }
  0xa9   : > { %2952 = shalt.err (!%p2949_p13)
}
  0xaa   : > { %2514 = dma.hbm_to_vmem [thread:$0]  (!%p3399_p4), %s3393_s30, 64, %s3395_s19, %s418_s18  }
  0xab   : > { %s2241_s15 = sshll.u32 %s3125_s24, 7  ;;  %s439_s9 = scalar_lea.vmem [#allocation5], %s2240_s2 }
  0xac   : > { %s3435_s11 = scalar_lea.hbm %s3655_s1, %s2241_s15  ;;  %s446_s25 = sshll.u32 %s439_s9, 4  ;;  %s447_s25 = int_to_ptr.vmem [resolvable:$true] %s446_s25 }
  0xad   : > { %s3698_s4 = sand.u32 1, %s3125_s24   ;;  %s2953_s6 = scalar_lea.hbm %s3435_s11, 128 }
  0xae   : > { %s436_s0 = scalar_lea.sflag [#allocation6], %s3698_s4  ;;  %p2954_p7 = scmp.ne.s32.totalorder %s3435_s11, %s2953_s6 }
  0xaf   : > { %s2958_s18 = scalar_lea.hbm %s3655_s1, 256  ;;  %p2959_p0 = scmp.lt.u32.totalorder %s3435_s11, %s3655_s1 }
  0xb0   : > { %p2956_p9 = pnand %p2954_p7, %p2925_p8  ;;  %p2960_p2 = scmp.lt.u32.totalorder %s2958_s18, %s2953_s6 }
  0xb1   : > { %p2962_p10 = scmp.lt.u32.totalorder %s2953_s6, %s3435_s11 }
  0xb2   : > { %p2957_p3 = pneg %p2956_p9  ;;  %p2961_p5 = por %p2960_p2, %p2959_p0 }
  0xb4   : > { %p2963_p1 = por %p2962_p10, %p2961_p5 }
  0xb6   : > { %p2964_p11 = pnand %p2963_p1, %p2957_p3 }
  0xb8   : > { %2967 = shalt.err (!%p2964_p11)
}
  0xb9   : > { %s2968_s2 = scalar_lea.vmem %s447_s25, 128  ;;  %s3138_s13 = smov [#allocation5]  }
  0xba   : > { %p2969_p12 = scmp.ne.s32.totalorder %s447_s25, %s2968_s2  ;;  %s2973_s17 = sshll.u32 %s3138_s13, 4  ;;  %s2974_s17 = int_to_ptr.vmem [resolvable:$false] %s2973_s17 }
  0xbb   : > { %s2975_s9 = scalar_lea.vmem %s2974_s17, 256  ;;  %p2976_p9 = scmp.lt.s32.totalorder %s447_s25, %s2974_s17 }
  0xbc   : > { %p2971_p13 = pnand %p2969_p12, %p2925_p8  ;;  %p2977_p6 = scmp.lt.s32.totalorder %s2975_s9, %s2968_s2 }
  0xbe   : > { %p2972_p7 = pneg %p2971_p13  ;;  %p2978_p0 = por %p2977_p6, %p2976_p9 }
  0xc0   : > { %p2979_p2 = pnand %p2978_p0, %p2972_p7 }
  0xc2   : > { %2982 = shalt.err (!%p2979_p2)
}
  0xc3   : > { %2517 = dma.hbm_to_vmem [thread:$0]  (!%p3399_p4), %s3435_s11, 128, %s447_s25, %s436_s0  }
  0xc4   : > { %p3699_p3 = scmp.ne.s32.totalorder %s3684_s28, 0 }
  0xc5   : > { %s3463_s6 = sand.u32 (!%p3699_p3), 1, %s3117_s22   ;;  %p3700_p6 = scmp.ne.s32.totalorder (!%p3699_p3), %s3693_s12, 0 }
  0xc6   : > { %455 = sbr.rel (%p3699_p3) target bundleno = 1281 (0x501), region = 60  ;;  %s2243_s4 = sshll.u32 (!%p3699_p3), %s3463_s6, 2 }
  0xc7   : > { %s458_s30 = scalar_lea.sflag (!%p3699_p3), [#allocation3], %s3463_s6  ;;  %s3467_s19 = scalar_lea.vmem (!%p3699_p3), [#allocation2], %s2243_s4 }
  0xcd   : > { %3084 = dma.done.wait (%p3700_p6), %s458_s30, 64  }
  0xce   : > { %3086 = vsyncadd (%p3700_p6), %s458_s30, 4294967232  ;;  %s466_s0 = sand.u32 1, %s3229_s27   ;;  %s3475_s28 = sshll.u32 %s3463_s6, 3 }
  0xcf   : > { %s467_s20 = scalar_lea.sflag [#allocation6], %s466_s0  ;;  %s470_s11 = scalar_lea.vmem [#allocation5], %s3475_s28 }
  0xd0   : > { %3088 = dma.done.wait (%p3700_p6), %s467_s20, 128  }
  0xd1   : > { %3090 = vsyncadd (%p3700_p6), %s467_s20, 4294967168  ;;  %p3701_p4 = scmp.eq.s32.totalorder %s3229_s27, 0 }
  0xd3   : > { %3092 = dma.done.wait (%p3701_p4), [#allocation6], 4096   ;;  %p3702_p8 = pmov %p3701_p4 }
  0xd4   : > { %p3703_p5 = pmov %p3701_p4 }
  0xd5   : > { %3094 = vsyncadd (%p3702_p8), [#allocation6], 4294963200 }
  0xd6   : > { %3096 = dma.done.wait (%p3703_p5), [#allocation9], 12288   ;;  %p3704_p10 = pmov %p3701_p4 }
  0xd7   : > { %p3705_p1 = pmov %p3701_p4 }
  0xd8   : > { %3098 = vsyncadd (%p3704_p10), [#allocation9], 4294955008 }
  0xd9   : > { %3100 = dma.done.wait (%p3705_p1), [#allocation12], 4096   ;;  %p3706_p11 = pmov %p3705_p1 }
  0xda   : > { %v3139_v0 = vmov 0   ;;  %v2581_v1 = vld [vmem:[#allocation7 + $0x4] ss:$16 sps:$4 sm:$0xff]   ;;  %v2583_v2 = vld [vmem:[#allocation7] ss:$16 sps:$4 sm:$0xff]   ;;  %s534_s15 = scalar_lea.vmem [#allocation14], %s3475_s28 }
  0xdb   : > { %3102 = vsyncadd (%p3706_p11), [#allocation12], 4294963200  ;;  %790 = vmatprep.mubr.bf16.mxu0 %v3139_v0  ;;  %831 = vmatprep.mubr.bf16.mxu1 %v3139_v0  ;;  %v2584_v3 = vld [vmem:[#allocation7 + $0x24] ss:$16 sps:$4 sm:$0xff]   ;;  %v2586_v4 = vld [vmem:[#allocation7 + $0x20] ss:$16 sps:$4 sm:$0xff]  }
  0xdc   : > { %758 = vmatprep.subr.bf16.mxu0 %v2581_v1  ;;  %v2587_v5 = vld [vmem:[#allocation7 + $0x44] ss:$16 sps:$4 sm:$0xff]   ;;  %v2589_v6 = vld [vmem:[#allocation7 + $0x40] ss:$16 sps:$4 sm:$0xff]   ;;  %v2605_v10 = vld [vmem:[#allocation7 + $0xc] ss:$16 sps:$4 sm:$0xff]  }
  0xdd   : > { %759 = vmatpush1.bf16.msra.mxu0 %v2583_v2  ;;  %v2590_v7 = vld [vmem:[#allocation7 + $0x64] ss:$16 sps:$4 sm:$0xff]   ;;  %v2592_v8 = vld [vmem:[#allocation7 + $0x60] ss:$16 sps:$4 sm:$0xff]   ;;  %v2607_v11 = vld [vmem:[#allocation7 + $0x8] ss:$16 sps:$4 sm:$0xff]   ;;  %799 = vmatprep.subr.bf16.mxu1 %v2605_v10 }
  0xde   : > { %760 = vmatprep.subr.bf16.mxu0 %v2584_v3  ;;  %v2593_v9 = vld [vmem:[#allocation7 + $0x84] ss:$16 sps:$4 sm:$0xff]   ;;  %v2608_v12 = vld [vmem:[#allocation7 + $0x2c] ss:$16 sps:$4 sm:$0xff]   ;;  %v2595_v13 = vld [vmem:[#allocation7 + $0x80] ss:$16 sps:$4 sm:$0xff]   ;;  %800 = vmatpush1.bf16.msra.mxu1 %v2607_v11 }
  0xdf   : > { %v2610_v14 = vld [vmem:[#allocation7 + $0x28] ss:$16 sps:$4 sm:$0xff]   ;;  %801 = vmatprep.subr.bf16.mxu1 %v2608_v12  ;;  %v2611_v15 = vld [vmem:[#allocation7 + $0x4c] ss:$16 sps:$4 sm:$0xff]   ;;  %v2596_v16 = vld [vmem:[#allocation7 + $0xa4] ss:$16 sps:$4 sm:$0xff]  }
  0xe0   : > { %v2598_v17 = vld [vmem:[#allocation7 + $0xa0] ss:$16 sps:$4 sm:$0xff]   ;;  %v2613_v18 = vld [vmem:[#allocation7 + $0x48] ss:$16 sps:$4 sm:$0xff]   ;;  %v2614_v19 = vld [vmem:[#allocation7 + $0x6c] ss:$16 sps:$4 sm:$0xff]  }
  0xe1   : > { %761 = vmatpush1.bf16.msra.mxu0 %v2586_v4  ;;  %v2599_v20 = vld [vmem:[#allocation7 + $0xc4] ss:$16 sps:$4 sm:$0xff]   ;;  %v2601_v21 = vld [vmem:[#allocation7 + $0xc0] ss:$16 sps:$4 sm:$0xff]   ;;  %v2616_v22 = vld [vmem:[#allocation7 + $0x68] ss:$16 sps:$4 sm:$0xff]  }
  0xe2   : > { %762 = vmatprep.subr.bf16.mxu0 %v2587_v5  ;;  %802 = vmatpush1.bf16.msra.mxu1 %v2610_v14  ;;  %v2617_v23 = vld [vmem:[#allocation7 + $0x8c] ss:$16 sps:$4 sm:$0xff]   ;;  %v2602_v24 = vld [vmem:[#allocation7 + $0xe4] ss:$16 sps:$4 sm:$0xff]   ;;  %v2604_v25 = vld [vmem:[#allocation7 + $0xe0] ss:$16 sps:$4 sm:$0xff]  }
  0xe3   : > { %803 = vmatprep.subr.bf16.mxu1 %v2611_v15  ;;  %v2619_v26 = vld [vmem:[#allocation7 + $0x88] ss:$16 sps:$4 sm:$0xff]   ;;  %v2620_v27 = vld [vmem:[#allocation7 + $0xac] ss:$16 sps:$4 sm:$0xff]   ;;  %v2725_v4 = vld [vmem:[#allocation10] ss:$16 sps:$4 sm:$0xff]  }
  0xe4   : > { %v2631_v28 = vld [vmem:[#allocation8 + $0x4] ss:$8 sps:$4 sm:$0xff]   ;;  %v2622_v30 = vld [vmem:[#allocation7 + $0xa8] ss:$16 sps:$4 sm:$0xff]   ;;  %v2634_v33 = vld [vmem:[#allocation8 + $0x14] ss:$8 sps:$4 sm:$0xff]  }
  0xe5   : > { %763 = vmatpush1.bf16.msra.mxu0 %v2589_v6  ;;  %v543_v29 = vld [vmem:[%s3467_s19] sm:$0xf]  ;;  %v2632_v36 = vld [vmem:[#allocation8 + $0x10] ss:$8 sps:$4 sm:$0xff]   ;;  %v2640_v40 = vld [vmem:[#allocation8 + $0x34] ss:$8 sps:$4 sm:$0xff]  }
  0xe6   : > { %764 = vmatprep.subr.bf16.mxu0 %v2590_v7  ;;  %804 = vmatpush1.bf16.msra.mxu1 %v2613_v18  ;;  %v2623_v31 = vld [vmem:[#allocation7 + $0xcc] ss:$16 sps:$4 sm:$0xff]   ;;  %v2629_v32 = vld [vmem:[#allocation8] ss:$8 sps:$4 sm:$0xff]   ;;  %v2638_v41 = vld [vmem:[#allocation8 + $0x30] ss:$8 sps:$4 sm:$0xff]  }
  0xe7   : > { %805 = vmatprep.subr.bf16.mxu1 %v2614_v19  ;;  %v2625_v34 = vld [vmem:[#allocation7 + $0xc8] ss:$16 sps:$4 sm:$0xff]   ;;  %v2626_v35 = vld [vmem:[#allocation7 + $0xec] ss:$16 sps:$4 sm:$0xff]   ;;  %v2727_v5 = vld [vmem:[#allocation10 + $0x4] ss:$16 sps:$4 sm:$0xff]  }
  0xe8   : > { %v2637_v37 = vld [vmem:[#allocation8 + $0x24] ss:$8 sps:$4 sm:$0xff]   ;;  %v2628_v38 = vld [vmem:[#allocation7 + $0xe8] ss:$16 sps:$4 sm:$0xff]   ;;  %v2646_v44 = vld [vmem:[#allocation8 + $0x54] ss:$8 sps:$4 sm:$0xff]  }
  0xe9   : > { %765 = vmatpush1.bf16.msra.mxu0 %v2592_v8  ;;  %v2635_v39 = vld [vmem:[#allocation8 + $0x20] ss:$8 sps:$4 sm:$0xff]   ;;  %v2643_v42 = vld [vmem:[#allocation8 + $0x44] ss:$8 sps:$4 sm:$0xff]   ;;  %v2644_v45 = vld [vmem:[#allocation8 + $0x50] ss:$8 sps:$4 sm:$0xff]   ;;  %v578_v8 = vlaneseq }
  0xea   : > { %766 = vmatprep.subr.bf16.mxu0 %v2593_v9  ;;  %806 = vmatpush1.bf16.msra.mxu1 %v2616_v22  ;;  %v2641_v43 = vld [vmem:[#allocation8 + $0x40] ss:$8 sps:$4 sm:$0xff]   ;;  %v2649_v46 = vld [vmem:[#allocation8 + $0x64] ss:$8 sps:$4 sm:$0xff]   ;;  %v2652_v48 = vld [vmem:[#allocation8 + $0x74] ss:$8 sps:$4 sm:$0xff]  }
  0xeb   : > { %807 = vmatprep.subr.bf16.mxu1 %v2617_v23  ;;  %v2647_v47 = vld [vmem:[#allocation8 + $0x60] ss:$8 sps:$4 sm:$0xff]   ;;  %v2650_v49 = vld [vmem:[#allocation8 + $0x70] ss:$8 sps:$4 sm:$0xff]   ;;  %v2655_v50 = vld [vmem:[#allocation8 + $0x84] ss:$8 sps:$4 sm:$0xff]  }
  0xec   : > { %v2653_v51 = vld [vmem:[#allocation8 + $0x80] ss:$8 sps:$4 sm:$0xff]   ;;  %v2658_v52 = vld [vmem:[#allocation8 + $0x94] ss:$8 sps:$4 sm:$0xff]   ;;  %v2656_v53 = vld [vmem:[#allocation8 + $0x90] ss:$8 sps:$4 sm:$0xff]  }
  0xed   : > { %767 = vmatpush1.bf16.msra.mxu0 %v2595_v13  ;;  %v2661_v54 = vld [vmem:[#allocation8 + $0xa4] ss:$8 sps:$4 sm:$0xff]   ;;  %v2659_v55 = vld [vmem:[#allocation8 + $0xa0] ss:$8 sps:$4 sm:$0xff]   ;;  %v2664_v56 = vld [vmem:[#allocation8 + $0xb4] ss:$8 sps:$4 sm:$0xff]  }
  0xee   : > { %768 = vmatprep.subr.bf16.mxu0 %v2596_v16  ;;  %808 = vmatpush1.bf16.msra.mxu1 %v2619_v26  ;;  %v2662_v57 = vld [vmem:[#allocation8 + $0xb0] ss:$8 sps:$4 sm:$0xff]   ;;  %v2667_v58 = vld [vmem:[#allocation8 + $0xc4] ss:$8 sps:$4 sm:$0xff]   ;;  %v2665_v59 = vld [vmem:[#allocation8 + $0xc0] ss:$8 sps:$4 sm:$0xff]  }
  0xef   : > { %809 = vmatprep.subr.bf16.mxu1 %v2620_v27  ;;  %v2670_v60 = vld [vmem:[#allocation8 + $0xd4] ss:$8 sps:$4 sm:$0xff]   ;;  %v2668_v61 = vld [vmem:[#allocation8 + $0xd0] ss:$8 sps:$4 sm:$0xff]   ;;  %v2673_v62 = vld [vmem:[#allocation8 + $0xe4] ss:$8 sps:$4 sm:$0xff]  }
  0xf0   : > { %v2671_v63 = vld [vmem:[#allocation8 + $0xe0] ss:$8 sps:$4 sm:$0xff]   ;;  %v2676_v1 = vld [vmem:[#allocation8 + $0xf4] ss:$8 sps:$4 sm:$0xff]   ;;  %v2674_v2 = vld [vmem:[#allocation8 + $0xf0] ss:$8 sps:$4 sm:$0xff]  }
  0xf1   : > { %769 = vmatpush1.bf16.msra.mxu0 %v2598_v17  ;;  %v2679_v3 = vld [vmem:[#allocation8 + $0x104] ss:$8 sps:$4 sm:$0xff]   ;;  %v2728_v7 = vld [vmem:[#allocation10 + $0x20] ss:$16 sps:$4 sm:$0xff]   ;;  %v3500_v9 = vshrl.u32 %v578_v8, 7  ;;  %s541_s2 = scalar_lea.vmem [#allocation16], %s3475_s28 }
  0xf2   : > { %770 = vmatprep.subr.bf16.mxu0 %v2599_v20  ;;  %810 = vmatpush1.bf16.msra.mxu1 %v2622_v30  ;;  %v2730_v6 = vld [vmem:[#allocation10 + $0x24] ss:$16 sps:$4 sm:$0xff]   ;;  %v3508_v11 = vld [vmem:[%s3657_s3] sm:$0xf]  ;;  %v2731_v8 = vld [vmem:[#allocation10 + $0x40] ss:$16 sps:$4 sm:$0xff]  }
  0xf3   : > { %811 = vmatprep.subr.bf16.mxu1 %v2623_v31  ;;  %v3503_v10 = vsub.s32 0, %v3500_v9  ;;  %v3511_v12 = vsub.s32 1, %v3500_v9  ;;  %v592_v23 = vsub.s32 3, %v3500_v9  ;;  %v2682_v27 = vld [vmem:[#allocation8 + $0x114] ss:$8 sps:$4 sm:$0xff]   ;;  %s3549_s9 = sshll.u32 %s3229_s27, 7 }
  0xf4   : > { %v2685_v30 = vld [vmem:[#allocation8 + $0x124] ss:$8 sps:$4 sm:$0xff]   ;;  %s3707_s19 = sld [smem:[#allocation30_spill]]  ;;  %s3561_s12 = scalar_lea.sflag [#allocation15], %s466_s0 }
  0xf5   : > { %771 = vmatpush1.bf16.msra.mxu0 %v2601_v21  ;;  %v581_v13 = vrot.slane %v3508_v11, %v3503_v10  ;;  %v585_v14 = vrot.slane %v3508_v11, %v3511_v12  ;;  %p3708_p13 = scmp.ne.s32.totalorder %s3694_s16, 0  ;;  %s3140_s18 = smov [#allocation14]  }
  0xf6   : > { %772 = vmatprep.subr.bf16.mxu0 %v2602_v24  ;;  %812 = vmatpush1.bf16.msra.mxu1 %v2625_v34  ;;  %s2987_s14 = sshll.u32 %s3140_s18, 4  ;;  %s2988_s14 = int_to_ptr.vmem [resolvable:$false] %s2987_s14 }
  0xf7   : > { %813 = vmatprep.subr.bf16.mxu1 %v2626_v35  ;;  %v2683_v35 = vld [vmem:[#allocation8 + $0x120] ss:$8 sps:$4 sm:$0xff]   ;;  %s2989_s13 = scalar_lea.vmem %s2988_s14, 256 }
  0xf9   : > { %773 = vmatpush1.bf16.msra.mxu0 %v2604_v25  ;;  %v2677_v25 = vld [vmem:[#allocation8 + $0x100] ss:$8 sps:$4 sm:$0xff]  }
  0xfa   : > { %1244 = vmatprep.subr.bf16.mxu0 %v2631_v28  ;;  %814 = vmatpush1.bf16.msra.mxu1 %v2628_v38  ;;  %v593_v28 = vrot.slane %v3508_v11, %v592_v23  ;;  %s3555_s20 = scalar_lea.hbm %s3707_s19, %s3549_s9 }
  0xfb   : > { %1547 = vmatprep.subr.bf16.mxu1 %v2727_v5 }
  0xfc   : > { %791 = vmatmul.mubr.bf16.vlgmr.msra.gmra.mrb[0].mxu0 %v543_v29 }
  0xfd   : > { %1245 = vmatpush1.bf16.msra.mxu0 %v2629_v32  ;;  %832 = vmatmul.mubr.bf16.vlgmr.msra.gmra.mrb[0].mxu1 %v543_v29  ;;  %v2680_v29 = vld [vmem:[#allocation8 + $0x110] ss:$8 sps:$4 sm:$0xff]  }
  0xfe   : > { %1246 = vmatprep.subr.bf16.mxu0 %v2634_v33  ;;  %1579 = vmatprep.mubr.bf16.mxu1 %v3139_v0 }
  0xff   : > { %1548 = vmatpush1.bf16.msra.mxu1 %v2725_v4  ;;  %v2722_v4 = vld [vmem:[#allocation8 + $0x1f0] ss:$8 sps:$4 sm:$0xff]  }
 0x100   : > { %1549 = vmatprep.subr.bf16.mxu1 %v2730_v6 }
 0x101   : > { %1247 = vmatpush1.bf16.msra.mxu0 %v2632_v36 }
 0x102   : > { %1248 = vmatprep.subr.bf16.mxu0 %v2637_v37  ;;  %v2688_v37 = vld [vmem:[#allocation8 + $0x134] ss:$8 sps:$4 sm:$0xff]  }
 0x103   : > { %1550 = vmatpush1.bf16.msra.mxu1 %v2728_v7  ;;  %v2733_v7 = vld [vmem:[#allocation10 + $0x44] ss:$16 sps:$4 sm:$0xff]  }
 0x104   : > { %1551 = vmatprep.subr.bf16.mxu1 %v2733_v7  ;;  %v2788_v7 = vld [vmem:[#allocation11 + $0x38] sm:$0xff]  }
 0x105   : > { %1249 = vmatpush1.bf16.msra.mxu0 %v2635_v39 }
 0x106   : > { %1250 = vmatprep.subr.bf16.mxu0 %v2640_v40  ;;  %v2686_v40 = vld [vmem:[#allocation8 + $0x130] ss:$8 sps:$4 sm:$0xff]  }
 0x107   : > { %1552 = vmatpush1.bf16.msra.mxu1 %v2731_v8  ;;  %v2789_v8 = vld [vmem:[#allocation11 + $0xc0] sm:$0xff]  }
 0x109   : > { %1251 = vmatpush1.bf16.msra.mxu0 %v2638_v41  ;;  %v2691_v41 = vld [vmem:[#allocation8 + $0x144] ss:$8 sps:$4 sm:$0xff]  }
 0x10a   : > { %1252 = vmatprep.subr.bf16.mxu0 %v2643_v42  ;;  %v2689_v42 = vld [vmem:[#allocation8 + $0x140] ss:$8 sps:$4 sm:$0xff]  }
 0x10d   : > { %1253 = vmatpush1.bf16.msra.mxu0 %v2641_v43  ;;  %v2694_v43 = vld [vmem:[#allocation8 + $0x154] ss:$8 sps:$4 sm:$0xff]  }
 0x10e   : > { %1254 = vmatprep.subr.bf16.mxu0 %v2646_v44  ;;  %v2692_v44 = vld [vmem:[#allocation8 + $0x150] ss:$8 sps:$4 sm:$0xff]  }
 0x111   : > { %1255 = vmatpush1.bf16.msra.mxu0 %v2644_v45  ;;  %v2697_v45 = vld [vmem:[#allocation8 + $0x164] ss:$8 sps:$4 sm:$0xff]  }
 0x112   : > { %1256 = vmatprep.subr.bf16.mxu0 %v2649_v46  ;;  %v2695_v46 = vld [vmem:[#allocation8 + $0x160] ss:$8 sps:$4 sm:$0xff]  }
 0x115   : > { %1257 = vmatpush1.bf16.msra.mxu0 %v2647_v47  ;;  %v2700_v47 = vld [vmem:[#allocation8 + $0x174] ss:$8 sps:$4 sm:$0xff]  }
 0x116   : > { %1258 = vmatprep.subr.bf16.mxu0 %v2652_v48  ;;  %v2698_v48 = vld [vmem:[#allocation8 + $0x170] ss:$8 sps:$4 sm:$0xff]  }
 0x119   : > { %1259 = vmatpush1.bf16.msra.mxu0 %v2650_v49  ;;  %v2703_v49 = vld [vmem:[#allocation8 + $0x184] ss:$8 sps:$4 sm:$0xff]  }
 0x11a   : > { %1260 = vmatprep.subr.bf16.mxu0 %v2655_v50  ;;  %v2701_v50 = vld [vmem:[#allocation8 + $0x180] ss:$8 sps:$4 sm:$0xff]  }
 0x11d   : > { %1261 = vmatpush1.bf16.msra.mxu0 %v2653_v51  ;;  %v2706_v51 = vld [vmem:[#allocation8 + $0x194] ss:$8 sps:$4 sm:$0xff]  }
 0x11e   : > { %1262 = vmatprep.subr.bf16.mxu0 %v2658_v52  ;;  %v2704_v52 = vld [vmem:[#allocation8 + $0x190] ss:$8 sps:$4 sm:$0xff]  }
 0x121   : > { %1263 = vmatpush1.bf16.msra.mxu0 %v2656_v53  ;;  %v2709_v53 = vld [vmem:[#allocation8 + $0x1a4] ss:$8 sps:$4 sm:$0xff]  }
 0x122   : > { %1264 = vmatprep.subr.bf16.mxu0 %v2661_v54  ;;  %v2707_v54 = vld [vmem:[#allocation8 + $0x1a0] ss:$8 sps:$4 sm:$0xff]  }
 0x125   : > { %1265 = vmatpush1.bf16.msra.mxu0 %v2659_v55  ;;  %v2712_v55 = vld [vmem:[#allocation8 + $0x1b4] ss:$8 sps:$4 sm:$0xff]  }
 0x126   : > { %1266 = vmatprep.subr.bf16.mxu0 %v2664_v56  ;;  %v2710_v56 = vld [vmem:[#allocation8 + $0x1b0] ss:$8 sps:$4 sm:$0xff]  }
 0x129   : > { %1267 = vmatpush1.bf16.msra.mxu0 %v2662_v57  ;;  %v2715_v57 = vld [vmem:[#allocation8 + $0x1c4] ss:$8 sps:$4 sm:$0xff]  }
 0x12a   : > { %1268 = vmatprep.subr.bf16.mxu0 %v2667_v58  ;;  %v2713_v58 = vld [vmem:[#allocation8 + $0x1c0] ss:$8 sps:$4 sm:$0xff]  }
 0x12d   : > { %1269 = vmatpush1.bf16.msra.mxu0 %v2665_v59  ;;  %v588_v59 = vsub.s32 2, %v3500_v9 }
 0x12e   : > { %1270 = vmatprep.subr.bf16.mxu0 %v2670_v60  ;;  %v2718_v60 = vld [vmem:[#allocation8 + $0x1d4] ss:$8 sps:$4 sm:$0xff]  }
 0x131   : > { %1271 = vmatpush1.bf16.msra.mxu0 %v2668_v61  ;;  %v2716_v61 = vld [vmem:[#allocation8 + $0x1d0] ss:$8 sps:$4 sm:$0xff]  }
 0x132   : > { %1272 = vmatprep.subr.bf16.mxu0 %v2673_v62  ;;  %v589_v62 = vrot.slane %v3508_v11, %v588_v59  ;;  %v2734_v11 = vld [vmem:[#allocation10 + $0x60] ss:$16 sps:$4 sm:$0xff]  }
 0x135   : > { %1273 = vmatpush1.bf16.msra.mxu0 %v2671_v63  ;;  %v2721_v63 = vld [vmem:[#allocation8 + $0x1e4] ss:$8 sps:$4 sm:$0xff]  }
 0x136   : > { %1274 = vmatprep.subr.bf16.mxu0 %v2676_v1  ;;  %v2719_v1 = vld [vmem:[#allocation8 + $0x1e0] ss:$8 sps:$4 sm:$0xff]  }
 0x139   : > { %1275 = vmatpush1.bf16.msra.mxu0 %v2674_v2 }
 0x13a   : > { %1285 = vmatprep.subr.bf16.mxu0 %v2679_v3  ;;  %v2724_v3 = vld [vmem:[#allocation8 + $0x1f4] ss:$8 sps:$4 sm:$0xff]  }
 0x1cf   : > { %v792_v15 = vpop.f32.mrb[0].mxu0 }
 0x1d0   : > { %v793_v16 = vadd.f32 %v792_v15, %v581_v13  ;;  %v794_v17 = vpop.f32.mrb[1].mxu0  ;;  %v833_v31 = vpop.f32.mrb[0].mxu1  ;;  %v2736_v13 = vld [vmem:[#allocation10 + $0x64] ss:$16 sps:$4 sm:$0xff]   ;;  %v2737_v15 = vld [vmem:[#allocation10 + $0x80] ss:$16 sps:$4 sm:$0xff]  }
 0x1d1   : > { %v795_v18 = vadd.f32 %v794_v17, %v585_v14  ;;  %v796_v19 = vpop.f32.mrb[2].mxu0  ;;  %v835_v32 = vpop.f32.mrb[1].mxu1  ;;  %v834_v2 = vadd.f32 %v833_v31, %v589_v62  ;;  %1553 = vmatprep.subr.bf16.mxu1 %v2736_v13  ;;  %v2739_v14 = vld [vmem:[#allocation10 + $0x84] ss:$16 sps:$4 sm:$0xff]   ;;  %v2740_v17 = vld [vmem:[#allocation10 + $0xa0] ss:$16 sps:$4 sm:$0xff]  }
 0x1d2   : > { %v840_v20 = vmax.f32 %v793_v16, 0.0  ;;  %v797_v21 = vpop.f32.mrb[3].mxu0  ;;  %v836_v33 = vadd.f32 %v835_v32, %v593_v28  ;;  %v837_v34 = vpop.f32.mrb[2].mxu1  ;;  %1554 = vmatpush1.bf16.msra.mxu1 %v2734_v11  ;;  %v2742_v16 = vld [vmem:[#allocation10 + $0xa4] ss:$16 sps:$4 sm:$0xff]   ;;  %v2780_v62 = vld [vmem:[#allocation11 + $0x18] sm:$0xff]  }
 0x1d3   : > { %v841_v22 = vmax.f32 %v795_v18, 0.0  ;;  %v838_v36 = vpop.f32.mrb[3].mxu1  ;;  %v842_v5 = vmax.f32 %v834_v2, 0.0  ;;  %1555 = vmatprep.subr.bf16.mxu1 %v2739_v14  ;;  %v2745_v18 = vld [vmem:[#allocation10 + $0xc4] ss:$16 sps:$4 sm:$0xff]   ;;  %v2783_v2 = vld [vmem:[#allocation11 + $0x68] sm:$0xff]  }
 0x1d4   : > { %v844_v26 = vpack.c.bf16 %v840_v20, %v840_v20  ;;  %v843_v38 = vmax.f32 %v836_v33, 0.0  ;;  %v2743_v19 = vld [vmem:[#allocation10 + $0xc0] ss:$16 sps:$4 sm:$0xff]   ;;  %v2748_v20 = vld [vmem:[#allocation10 + $0xe4] ss:$16 sps:$4 sm:$0xff]  }
 0x1d5   : > { %v845_v24 = vpack.c.bf16 %v841_v22, %v841_v22  ;;  %v846_v6 = vpack.c.bf16 %v842_v5, %v842_v5  ;;  %v2746_v21 = vld [vmem:[#allocation10 + $0xe0] ss:$16 sps:$4 sm:$0xff]   ;;  %v2751_v22 = vld [vmem:[#allocation10 + $0xc] ss:$16 sps:$4 sm:$0xff]   ;;  %v1365_v13 = vld [vmem:[%s3661_s7] sm:$0xf] }
 0x1d6   : > { %v847_v39 = vpack.c.bf16 %v843_v38, %v843_v38  ;;  %1556 = vmatpush1.bf16.msra.mxu1 %v2737_v15  ;;  %v2786_v5 = vld [vmem:[#allocation11 + $0x30] sm:$0xff]   ;;  %v1370_v11 = vrot.slane %v1365_v13, %v3503_v10  ;;  %v1374_v14 = vrot.slane %v1365_v13, %v3511_v12 }
 0x1d7   : > { %1276 = vmatprep.mubr.bf16.mxu0 %v845_v24  ;;  %1557 = vmatprep.subr.bf16.mxu1 %v2742_v16  ;;  %v912_v24 = vld [vmem:[%s3659_s5] sm:$0x3] }
 0x1d8   : > { %1277 = vmatmul.mubr.bf16.vlgmr.msra.gmra.mrb[4].mxu0 %v844_v26  ;;  %v921_v26 = vrot.slane %v912_v24, %v3511_v12  ;;  %v2794_v12 = vld [vmem:[#allocation11 + $0x90] sm:$0xff]  }
 0x1d9   : > { %1286 = vmatpush1.bf16.msra.mxu0 %v2677_v25  ;;  %1317 = vmatprep.mubr.bf16.mxu0 %v847_v39  ;;  %v917_v25 = vrot.slane %v912_v24, %v3503_v10  ;;  %v2749_v39 = vld [vmem:[#allocation10 + $0x8] ss:$16 sps:$4 sm:$0xff]   ;;  %v2793_v10 = vld [vmem:[#allocation11 + $0xd0] sm:$0xff]  }
 0x1da   : > { %1287 = vmatprep.subr.bf16.mxu0 %v2682_v27  ;;  %1558 = vmatpush1.bf16.msra.mxu1 %v2740_v17 }
 0x1db   : > { %1559 = vmatprep.subr.bf16.mxu1 %v2745_v18 }
 0x1dd   : > { %1288 = vmatpush1.bf16.msra.mxu0 %v2680_v29 }
 0x1de   : > { %1289 = vmatprep.subr.bf16.mxu0 %v2685_v30  ;;  %1560 = vmatpush1.bf16.msra.mxu1 %v2743_v19 }
 0x1df   : > { %1561 = vmatprep.subr.bf16.mxu1 %v2748_v20 }
 0x1e1   : > { %1290 = vmatpush1.bf16.msra.mxu0 %v2683_v35  ;;  %v1326_v35 = vld [vmem:[%s470_s11] sm:$0xff]  ;;  %s2026_s11 = sshll.u32 %s534_s15, 4  ;;  %s2027_s11 = int_to_ptr.vmem [resolvable:$true] %s2026_s11 }
 0x1e2   : > { %1291 = vmatprep.subr.bf16.mxu0 %v2688_v37  ;;  %1562 = vmatpush1.bf16.msra.mxu1 %v2746_v21  ;;  %s2983_s25 = scalar_lea.vmem %s2027_s11, 128  ;;  %p2990_p0 = scmp.lt.s32.totalorder %s2027_s11, %s2988_s14 }
 0x1e3   : > { %1588 = vmatprep.subr.bf16.mxu1 %v2751_v22  ;;  %p2984_p12 = scmp.ne.s32.totalorder %s2027_s11, %s2983_s25  ;;  %p2991_p2 = scmp.lt.s32.totalorder %s2989_s13, %s2983_s25 }
 0x1e5   : > { %1292 = vmatpush1.bf16.msra.mxu0 %v2686_v40  ;;  %p2985_p7 = pnand %p2984_p12, %p3708_p13  ;;  %p2992_p3 = por %p2991_p2, %p2990_p0 }
 0x1e6   : > { %1293 = vmatprep.subr.bf16.mxu0 %v2691_v41  ;;  %v2754_v41 = vld [vmem:[#allocation10 + $0x2c] ss:$16 sps:$4 sm:$0xff]  }
 0x1e7   : > { %p2986_p9 = pneg %p2985_p7 }
 0x1e9   : > { %1294 = vmatpush1.bf16.msra.mxu0 %v2689_v42  ;;  %v2752_v42 = vld [vmem:[#allocation10 + $0x28] ss:$16 sps:$4 sm:$0xff]   ;;  %p2993_p6 = pnand %p2992_p3, %p2986_p9 }
 0x1ea   : > { %1295 = vmatprep.subr.bf16.mxu0 %v2694_v43  ;;  %v2757_v43 = vld [vmem:[#allocation10 + $0x4c] ss:$16 sps:$4 sm:$0xff]  }
 0x1ed   : > { %1296 = vmatpush1.bf16.msra.mxu0 %v2692_v44  ;;  %v2755_v44 = vld [vmem:[#allocation10 + $0x48] ss:$16 sps:$4 sm:$0xff]  }
 0x1ee   : > { %1297 = vmatprep.subr.bf16.mxu0 %v2697_v45  ;;  %v2760_v45 = vld [vmem:[#allocation10 + $0x6c] ss:$16 sps:$4 sm:$0xff]  }
 0x1f1   : > { %1298 = vmatpush1.bf16.msra.mxu0 %v2695_v46  ;;  %v2758_v46 = vld [vmem:[#allocation10 + $0x68] ss:$16 sps:$4 sm:$0xff]  }
 0x1f2   : > { %1299 = vmatprep.subr.bf16.mxu0 %v2700_v47  ;;  %v2763_v47 = vld [vmem:[#allocation10 + $0x8c] ss:$16 sps:$4 sm:$0xff]  }
 0x1f5   : > { %1300 = vmatpush1.bf16.msra.mxu0 %v2698_v48  ;;  %v2761_v48 = vld [vmem:[#allocation10 + $0x88] ss:$16 sps:$4 sm:$0xff]  }
 0x1f6   : > { %1301 = vmatprep.subr.bf16.mxu0 %v2703_v49  ;;  %v2766_v49 = vld [vmem:[#allocation10 + $0xac] ss:$16 sps:$4 sm:$0xff]  }
 0x1f9   : > { %1302 = vmatpush1.bf16.msra.mxu0 %v2701_v50  ;;  %v2764_v50 = vld [vmem:[#allocation10 + $0xa8] ss:$16 sps:$4 sm:$0xff]  }
 0x1fa   : > { %1303 = vmatprep.subr.bf16.mxu0 %v2706_v51  ;;  %v2769_v51 = vld [vmem:[#allocation10 + $0xcc] ss:$16 sps:$4 sm:$0xff]  }
 0x1fd   : > { %1304 = vmatpush1.bf16.msra.mxu0 %v2704_v52  ;;  %v2772_v52 = vld [vmem:[#allocation10 + $0xec] ss:$16 sps:$4 sm:$0xff]  }
 0x1fe   : > { %1305 = vmatprep.subr.bf16.mxu0 %v2709_v53  ;;  %v2770_v53 = vld [vmem:[#allocation10 + $0xe8] ss:$16 sps:$4 sm:$0xff]  }
 0x201   : > { %1306 = vmatpush1.bf16.msra.mxu0 %v2707_v54  ;;  %v2773_v54 = vld [vmem:[#allocation11 + $0x40] sm:$0xff]  }
 0x202   : > { %1307 = vmatprep.subr.bf16.mxu0 %v2712_v55  ;;  %v2774_v55 = vld [vmem:[#allocation11] sm:$0xff]  }
 0x205   : > { %1308 = vmatpush1.bf16.msra.mxu0 %v2710_v56  ;;  %v2775_v56 = vld [vmem:[#allocation11 + $0x48] sm:$0xff]  }
 0x206   : > { %1309 = vmatprep.subr.bf16.mxu0 %v2715_v57  ;;  %v2776_v57 = vld [vmem:[#allocation11 + $0x8] sm:$0xff]  }
 0x209   : > { %1310 = vmatpush1.bf16.msra.mxu0 %v2713_v58  ;;  %v2777_v58 = vld [vmem:[#allocation11 + $0x50] sm:$0xff]  }
 0x20a   : > { %1311 = vmatprep.subr.bf16.mxu0 %v2718_v60  ;;  %v2778_v60 = vld [vmem:[#allocation11 + $0x10] sm:$0xff]  }
 0x20d   : > { %1312 = vmatpush1.bf16.msra.mxu0 %v2716_v61  ;;  %v2779_v61 = vld [vmem:[#allocation11 + $0x58] sm:$0xff]  }
 0x20e   : > { %1313 = vmatprep.subr.bf16.mxu0 %v2721_v63  ;;  %v2781_v63 = vld [vmem:[#allocation11 + $0x60] sm:$0xff]  }
 0x211   : > { %1314 = vmatpush1.bf16.msra.mxu0 %v2719_v1  ;;  %v2782_v1 = vld [vmem:[#allocation11 + $0x20] sm:$0xff]  }
 0x212   : > { %1315 = vmatprep.subr.bf16.mxu0 %v2724_v3  ;;  %v2784_v3 = vld [vmem:[#allocation11 + $0x28] sm:$0xff]  }
 0x215   : > { %1316 = vmatpush1.bf16.msra.mxu0 %v2722_v4  ;;  %v2785_v4 = vld [vmem:[#allocation11 + $0x70] sm:$0xff]  }
 0x218   : > { %1318 = vmatmul.mubr.bf16.vlgmr.msra.gmra.mrb[4].mxu0 %v846_v6  ;;  %v2787_v6 = vld [vmem:[#allocation11 + $0x78] sm:$0xff]  }
 0x2eb   : > { %v1319_v27 = vpop.f32.mrb[4].mxu0 }
 0x2ec   : > { %v2466_v28 = vadd.f32 %v1319_v27, %v917_v25  ;;  %v1321_v29 = vpop.f32.mrb[5].mxu0  ;;  %v2790_v25 = vld [vmem:[#allocation11 + $0x80] sm:$0xff]   ;;  %v2791_v27 = vld [vmem:[#allocation11 + $0xc8] sm:$0xff]  }
 0x2ed   : > { %v2467_v30 = vadd.f32 %v1321_v29, %v921_v26  ;;  %v1323_v31 = vpop.f32.mrb[6].mxu0  ;;  %v2795_v29 = vld [vmem:[#allocation11 + $0xd8] sm:$0xff]  }
 0x2ee   : > { %1987 = vst [vmem:[%s534_s15] sm:$0xff] %v2466_v28  ;;  %v1324_v32 = vpop.f32.mrb[7].mxu0  ;;  %v2797_v31 = vld [vmem:[#allocation11 + $0xe0] sm:$0xff]  }
 0x2ef   : > { %v1327_v33 = vmul.f32 0.5, %v2467_v30  ;;  %1988 = vst [vmem:[%s541_s2] sm:$0xff] %v2467_v30  ;;  %v2796_v30 = vld [vmem:[#allocation11 + $0x98] sm:$0xff]   ;;  %v2798_v32 = vld [vmem:[#allocation11 + $0xa0] sm:$0xff]  }
 0x2f1   : > { %v1328_v34 = vmul.f32 1.442695, %v1327_v33  ;;  %v2799_v33 = vld [vmem:[#allocation11 + $0xe8] sm:$0xff]  }
 0x2f3   : > { %2805 = vpow2.f32 %v1328_v34  ;;  %v2800_v34 = vld [vmem:[#allocation11 + $0xa8] sm:$0xff]  }
 0x2fd   : > { %v2806_v36 = vpop.eup %2805 }
 0x2fe   : > { %v1330_v37 = vmul.f32 %v2806_v36, %v1326_v35  ;;  %v2801_v35 = vld [vmem:[#allocation11 + $0xf0] sm:$0xff]   ;;  %v1378_v36 = vrot.slane %v1365_v13, %v588_v59 }
 0x300   : > { %v1331_v38 = vadd.f32 %v2466_v28, %v1330_v37  ;;  %v2792_v28 = vld [vmem:[#allocation11 + $0x88] sm:$0xff]   ;;  %v1382_v37 = vrot.slane %v1365_v13, %v592_v23 }
 0x302   : > { %v1332_v40 = vpack.c.bf16 %v1331_v38, %v1331_v38  ;;  %v2802_v38 = vld [vmem:[#allocation11 + $0xb0] sm:$0xff]  }
 0x304   : > { %1580 = vmatmul.mubr.bf16.vlgmr.msra.gmra.mrb[4].mxu1 %v1332_v40 }
 0x305   : > { %1589 = vmatpush1.bf16.msra.mxu1 %v2749_v39  ;;  %1620 = vmatprep.mubr.bf16.mxu1 %v3139_v0  ;;  %v2767_v0 = vld [vmem:[#allocation10 + $0xc8] ss:$16 sps:$4 sm:$0xff]  }
 0x306   : > { %1590 = vmatprep.subr.bf16.mxu1 %v2754_v41  ;;  %v2803_v39 = vld [vmem:[#allocation11 + $0xf8] sm:$0xff]  }
 0x309   : > { %1591 = vmatpush1.bf16.msra.mxu1 %v2752_v42 }
 0x30a   : > { %1592 = vmatprep.subr.bf16.mxu1 %v2757_v43 }
 0x30d   : > { %1593 = vmatpush1.bf16.msra.mxu1 %v2755_v44 }
 0x30e   : > { %1594 = vmatprep.subr.bf16.mxu1 %v2760_v45  ;;  %v2804_v45 = vld [vmem:[#allocation11 + $0xb8] sm:$0xff]  }
 0x311   : > { %1595 = vmatpush1.bf16.msra.mxu1 %v2758_v46 }
 0x312   : > { %1596 = vmatprep.subr.bf16.mxu1 %v2763_v47 }
 0x315   : > { %1597 = vmatpush1.bf16.msra.mxu1 %v2761_v48 }
 0x316   : > { %1598 = vmatprep.subr.bf16.mxu1 %v2766_v49 }
 0x319   : > { %1599 = vmatpush1.bf16.msra.mxu1 %v2764_v50 }
 0x31a   : > { %1600 = vmatprep.subr.bf16.mxu1 %v2769_v51 }
 0x31d   : > { %1601 = vmatpush1.bf16.msra.mxu1 %v2767_v0 }
 0x31e   : > { %1602 = vmatprep.subr.bf16.mxu1 %v2772_v52 }
 0x321   : > { %1603 = vmatpush1.bf16.msra.mxu1 %v2770_v53 }
 0x322   : > { %2422 = vmatprep.subr.bf16.mxu1 %v2773_v54 }
 0x324   : > { %1621 = vmatmul.mubr.bf16.vlgmr.msra.gmra.mrb[8].mxu1 %v1332_v40 }
 0x325   : > { %2423 = vmatpush3.bf16.msra.mxu1 %v2774_v55 }
 0x326   : > { %2424 = vmatprep.subr.bf16.mxu1 %v2775_v56 }
 0x329   : > { %2425 = vmatpush3.bf16.msra.mxu1 %v2776_v57 }
 0x32a   : > { %2426 = vmatprep.subr.bf16.mxu1 %v2777_v58 }
 0x32d   : > { %2427 = vmatpush3.bf16.msra.mxu1 %v2778_v60 }
 0x32e   : > { %2428 = vmatprep.subr.bf16.mxu1 %v2779_v61 }
 0x331   : > { %2429 = vmatpush3.bf16.msra.mxu1 %v2780_v62 }
 0x332   : > { %2430 = vmatprep.subr.bf16.mxu1 %v2781_v63 }
 0x335   : > { %2431 = vmatpush3.bf16.msra.mxu1 %v2782_v1 }
 0x336   : > { %2432 = vmatprep.subr.bf16.mxu1 %v2783_v2 }
 0x339   : > { %2433 = vmatpush3.bf16.msra.mxu1 %v2784_v3 }
 0x33a   : > { %2434 = vmatprep.subr.bf16.mxu1 %v2785_v4 }
 0x33d   : > { %2435 = vmatpush3.bf16.msra.mxu1 %v2786_v5 }
 0x33e   : > { %2436 = vmatprep.subr.bf16.mxu1 %v2787_v6 }
 0x341   : > { %2437 = vmatpush3.bf16.msra.mxu1 %v2788_v7 }
 0x342   : > { %2444 = vmatprep.subr.bf16.mxu1 %v2789_v8 }
 0x3d7   : > { %v1581_v15 = vpop.f32.mrb[4].mxu1 }
 0x3d8   : > { %v1582_v16 = vadd.f32 %v1581_v15, %v1370_v11  ;;  %v1583_v17 = vpop.f32.mrb[5].mxu1 }
 0x3d9   : > { %v1584_v18 = vadd.f32 %v1583_v17, %v1374_v14  ;;  %v1585_v19 = vpop.f32.mrb[6].mxu1 }
 0x3da   : > { %v1629_v20 = vmax.f32 %v1582_v16, 0.0  ;;  %v1586_v21 = vpop.f32.mrb[7].mxu1 }
 0x3db   : > { %v1630_v22 = vmax.f32 %v1584_v18, 0.0 }
 0x3dc   : > { %v1633_v26 = vpack.c.bf16 %v1629_v20, %v1629_v20 }
 0x3dd   : > { %v1634_v24 = vpack.c.bf16 %v1630_v22, %v1630_v22 }
 0x3df   : > { %1932 = vmatprep.mubr.bf16.mxu1 %v1634_v24 }
 0x3e0   : > { %1933 = vmatmul.mubr.bf16.vlgmr.msra.gmra.mrb[12].mxu1 %v1633_v26 }
 0x3e1   : > { %2445 = vmatpush3.bf16.msra.mxu1 %v2790_v25 }
 0x3e2   : > { %2446 = vmatprep.subr.bf16.mxu1 %v2791_v27 }
 0x3e5   : > { %2447 = vmatpush3.bf16.msra.mxu1 %v2792_v28 }
 0x3e6   : > { %2448 = vmatprep.subr.bf16.mxu1 %v2793_v10 }
 0x3e9   : > { %2449 = vmatpush3.bf16.msra.mxu1 %v2794_v12 }
 0x3ea   : > { %2450 = vmatprep.subr.bf16.mxu1 %v2795_v29 }
 0x3ed   : > { %2451 = vmatpush3.bf16.msra.mxu1 %v2796_v30 }
 0x3ee   : > { %2452 = vmatprep.subr.bf16.mxu1 %v2797_v31 }
 0x3f1   : > { %2453 = vmatpush3.bf16.msra.mxu1 %v2798_v32 }
 0x3f2   : > { %2454 = vmatprep.subr.bf16.mxu1 %v2799_v33 }
 0x3f5   : > { %2455 = vmatpush3.bf16.msra.mxu1 %v2800_v34 }
 0x3f6   : > { %2456 = vmatprep.subr.bf16.mxu1 %v2801_v35 }
 0x3f7   : > { %v1622_v40 = vpop.f32.mrb[8].mxu1 }
 0x3f8   : > { %v1623_v41 = vadd.f32 %v1622_v40, %v1378_v36  ;;  %v1624_v42 = vpop.f32.mrb[9].mxu1 }
 0x3f9   : > { %v1625_v43 = vadd.f32 %v1624_v42, %v1382_v37  ;;  %v1626_v44 = vpop.f32.mrb[10].mxu1  ;;  %2457 = vmatpush3.bf16.msra.mxu1 %v2802_v38 }
 0x3fa   : > { %v1631_v46 = vmax.f32 %v1623_v41, 0.0  ;;  %v1627_v59 = vpop.f32.mrb[11].mxu1  ;;  %2458 = vmatprep.subr.bf16.mxu1 %v2803_v39 }
 0x3fb   : > { %v1632_v47 = vmax.f32 %v1625_v43, 0.0 }
 0x3fc   : > { %v1635_v23 = vpack.c.bf16 %v1631_v46, %v1631_v46 }
 0x3fd   : > { %v1636_v9 = vpack.c.bf16 %v1632_v47, %v1632_v47  ;;  %2459 = vmatpush3.bf16.msra.mxu1 %v2804_v45 }
 0x3ff   : > { %1972 = vmatprep.mubr.bf16.mxu1 %v1636_v9 }
 0x400   : > { %1973 = vmatmul.mubr.bf16.vlgmr.msra.gmra.mrb[16].mxu1 %v1635_v23 }
 0x401   : > { %2996 = shalt.err (!%p2993_p6)
}
 0x402   : > { %s2997_s27 = scalar_lea.hbm %s3555_s20, 128  ;;  %s3001_s17 = scalar_lea.hbm %s3707_s19, 256 }
 0x403   : > { %p2998_p4 = scmp.ne.s32.totalorder %s3555_s20, %s2997_s27  ;;  %p3002_p10 = scmp.lt.u32.totalorder %s3555_s20, %s3707_s19 }
 0x404   : > { %p3003_p1 = scmp.lt.u32.totalorder %s3001_s17, %s2997_s27  ;;  %p3005_p12 = scmp.lt.u32.totalorder %s2997_s27, %s3555_s20 }
 0x405   : > { %p2999_p8 = pnand %p2998_p4, %p3708_p13 }
 0x406   : > { %p3004_p11 = por %p3003_p1, %p3002_p10 }
 0x407   : > { %p3000_p5 = pneg %p2999_p8 }
 0x408   : > { %p3006_p7 = por %p3005_p12, %p3004_p11 }
 0x40a   : > { %p3007_p9 = pnand %p3006_p7, %p3000_p5 }
 0x40c   : > { %3010 = shalt.err (!%p3007_p9)
}
 0x40d   : > { %2493 = dma.vmem_to_hbm [thread:$0]  (%p3708_p13), %s2027_s11, 128, %s3555_s20, %s3561_s12  }
 0x40e   : > { %s2039_s25 = sshll.u32 %s541_s2, 4  ;;  %s3709_s13 = sld [smem:[#allocation31_spill]]  ;;  %s2040_s25 = int_to_ptr.vmem [resolvable:$true] %s2039_s25 }
 0x40f   : > { %s3011_s15 = scalar_lea.vmem %s2040_s25, 128  ;;  %s3141_s27 = smov [#allocation16]  }
 0x410   : > { %p3012_p0 = scmp.ne.s32.totalorder %s2040_s25, %s3011_s15  ;;  %s3015_s17 = sshll.u32 %s3141_s27, 4  ;;  %s3016_s17 = int_to_ptr.vmem [resolvable:$false] %s3015_s17 }
 0x411   : > { %s3017_s4 = scalar_lea.vmem %s3016_s17, 256  ;;  %p3018_p6 = scmp.lt.s32.totalorder %s2040_s25, %s3016_s17 }
 0x412   : > { %p3013_p2 = pnand %p3012_p0, %p3708_p13  ;;  %p3019_p4 = scmp.lt.s32.totalorder %s3017_s4, %s3011_s15 }
 0x414   : > { %s2037_s0 = scalar_lea.hbm %s3709_s13, %s3549_s9  ;;  %p3014_p3 = pneg %p3013_p2 }
 0x415   : > { %p3020_p8 = por %p3019_p4, %p3018_p6 }
 0x417   : > { %p3021_p5 = pnand %p3020_p8, %p3014_p3 }
 0x419   : > { %3024 = shalt.err (!%p3021_p5)
}
 0x41a   : > { %s3025_s2 = scalar_lea.hbm %s2037_s0, 128  ;;  %s3029_s30 = scalar_lea.hbm %s3709_s13, 256 }
 0x41b   : > { %p3026_p10 = scmp.ne.s32.totalorder %s2037_s0, %s3025_s2  ;;  %p3030_p12 = scmp.lt.u32.totalorder %s2037_s0, %s3709_s13 }
 0x41c   : > { %p3031_p7 = scmp.lt.u32.totalorder %s3029_s30, %s3025_s2  ;;  %p3033_p0 = scmp.lt.u32.totalorder %s3025_s2, %s2037_s0 }
 0x41d   : > { %p3027_p1 = pnand %p3026_p10, %p3708_p13 }
 0x41e   : > { %p3032_p9 = por %p3031_p7, %p3030_p12 }
 0x41f   : > { %p3028_p11 = pneg %p3027_p1 }
 0x420   : > { %p3034_p2 = por %p3033_p0, %p3032_p9 }
 0x422   : > { %p3035_p3 = pnand %p3034_p2, %p3028_p11 }
 0x424   : > { %3038 = shalt.err (!%p3035_p3)
}
 0x425   : > { %2494 = dma.vmem_to_hbm [thread:$0]  (%p3708_p13), %s2040_s25, 128, %s2037_s0, %s3561_s12  }
 0x426   : > { %s3710_s17 = sld [smem:[#allocation28_spill]]  ;;  %s527_s12 = scalar_lea.vmem [#allocation13], %s3475_s28 }
 0x427   : > { %s2013_s25 = sshll.u32 %s527_s12, 4  ;;  %s3711_s2 = sld [smem:[#allocation29_spill]]  ;;  %s3610_s25 = int_to_ptr.vmem [resolvable:$true] %s2013_s25 }
 0x428   : > { %s1990_s11 = scalar_lea.sflag [#allocation4], %s3463_s6  ;;  %s3039_s30 = scalar_lea.vmem %s3610_s25, 128 }
 0x429   : > { %p3040_p6 = scmp.ne.s32.totalorder %s3610_s25, %s3039_s30  ;;  %s3142_s28 = smov [#allocation13]  }
 0x42a   : > { %s3043_s18 = sshll.u32 %s3142_s28, 4  ;;  %s3044_s18 = int_to_ptr.vmem [resolvable:$false] %s3043_s18 }
 0x42b   : > { %p3041_p4 = pnand %p3040_p6, %p3708_p13  ;;  %s3045_s14 = scalar_lea.vmem %s3044_s18, 256 }
 0x42c   : > { %v2380_v52 = vld [vmem:[%s3710_s17] ss:$0 sm:$0xff]  ;;  %p3046_p5 = scmp.lt.s32.totalorder %s3610_s25, %s3044_s18  ;;  %p3047_p10 = scmp.lt.s32.totalorder %s3045_s14, %s3039_s30 }
 0x42d   : > { %s3608_s20 = scalar_lea.hbm %s3711_s2, %s3549_s9  ;;  %p3042_p8 = pneg %p3041_p4 }
 0x42e   : > { %p3048_p1 = por %p3047_p10, %p3046_p5 }
 0x430   : > { %p3049_p11 = pnand %p3048_p1, %p3042_p8 }
 0x4b3   : > { %v2438_v48 = vpop.f32.mrb[12].mxu1 }
 0x4b4   : > { %v2439_v49 = vpop.f32.mrb[13].mxu1 }
 0x4b5   : > { %v2440_v50 = vadd.f32 %v2439_v49, %v2438_v48  ;;  %v2441_v51 = vpop.f32.mrb[14].mxu1 }
 0x4b6   : > { %v2442_v0 = vpop.f32.mrb[15].mxu1 }
 0x4b7   : > { %v1935_v55 = vadd.f32 %v2440_v50, %v2380_v52 }
 0x4d3   : > { %v2460_v53 = vpop.f32.mrb[16].mxu1 }
 0x4d4   : > { %v2461_v54 = vpop.f32.mrb[17].mxu1 }
 0x4d5   : > { %v2462_v56 = vadd.f32 %v2461_v54, %v2460_v53  ;;  %v2463_v57 = vpop.f32.mrb[18].mxu1 }
 0x4d6   : > { %v2464_v58 = vpop.f32.mrb[19].mxu1 }
 0x4d7   : > { %v1975_v60 = vadd.f32 %v2462_v56, %v1935_v55 }
 0x4d9   : > { %v2413_v61 = vmul.f32 -1.442695, %v1975_v60 }
 0x4db   : > { %2807 = vpow2.f32 %v2413_v61 }
 0x4e5   : > { %v2808_v62 = vpop.eup %2807 }
 0x4e6   : > { %v1983_v63 = vadd.f32 1.0, %v2808_v62 }
 0x4e8   : > { %2809 = vrcp.f32 %v1983_v63 }
 0x4f2   : > { %v2810_v1 = vpop.eup %2809 }
 0x4f3   : > { %1986 = vst [vmem:[%s527_s12] sm:$0xff] %v2810_v1 }
 0x4f4   : > { %3052 = shalt.err (!%p3049_p11)
}
 0x4f5   : > { %s3053_s6 = scalar_lea.hbm %s3608_s20, 128  ;;  %s3057_s27 = scalar_lea.hbm %s3711_s2, 256 }
 0x4f6   : > { %p3054_p12 = scmp.ne.s32.totalorder %s3608_s20, %s3053_s6  ;;  %p3058_p0 = scmp.lt.u32.totalorder %s3608_s20, %s3711_s2 }
 0x4f7   : > { %p3059_p2 = scmp.lt.u32.totalorder %s3057_s27, %s3053_s6  ;;  %p3061_p6 = scmp.lt.u32.totalorder %s3053_s6, %s3608_s20 }
 0x4f8   : > { %p3055_p7 = pnand %p3054_p12, %p3708_p13 }
 0x4f9   : > { %p3060_p3 = por %p3059_p2, %p3058_p0 }
 0x4fa   : > { %p3056_p9 = pneg %p3055_p7 }
 0x4fb   : > { %p3062_p4 = por %p3061_p6, %p3060_p3 }
 0x4fd   : > { %p3063_p8 = pnand %p3062_p4, %p3056_p9 }
 0x4ff   : > { %3066 = shalt.err (!%p3063_p8)
}
 0x500   : > { %2492 = dma.vmem_to_hbm [thread:$0]  (%p3708_p13), %s3610_s25, 128, %s3608_s20, %s1990_s11  }
 0x501 PF: > { %s2051_s0 = sand.u32 1, %s3113_s21   ;;  %p3712_p5 = scmp.ne.s32.totalorder %s3695_s26, 0 }
 0x502   : > { %p3713_p10 = scmp.ge.s32.totalorder %s3125_s24, 2  ;;  %s2052_s4 = scalar_lea.sflag [#allocation4], %s2051_s0 }
 0x504   : > { %p2519_p1 = pnand %p3713_p10, %p3712_p5 }
 0x506   : > { %3104 = dma.done.wait (!%p2519_p1), %s2052_s4, 128  }
 0x507   : > { %3106 = vsyncadd (!%p2519_p1), %s2052_s4, 4294967168  ;;  %s3714_s30 = sadd.s32 4294967294, %s3125_s24  }
 0x508   : > { %s2060_s28 = sand.u32 1, %s3714_s30  }
 0x509   : > { %s2061_s18 = scalar_lea.sflag [#allocation15], %s2060_s28 }
 0x50a   : > { %3108 = dma.done.wait (!%p2519_p1), %s2061_s18, 256  }
 0x50b   : > { %3110 = vsyncadd (!%p2519_p1), %s2061_s18, 4294967040  ;;  %p34_p13 = scmp.ge.s32.totalorder %s3350_s10, 4   ;;  %s3715_s21 = smov %s3117_s22 }
 0x50c   : > { %s3716_s22 = smov %s3121_s23  ;;  %s3717_s23 = smov %s3361_s29 }
 0x50d   : > { %s3718_s24 = smov %s3350_s10  ;;  %36 = sbr.rel (!%p34_p13) target bundleno = 20 (0x14), region = 166 }
 0x514   :  { %2075 = vsyncpa [#allocation3], 1 }
 0x515   :  { %2077 = vsyncpa [#allocation3 + $0x1], 1 }
 0x516   :  { %2078 = vsyncpa [#allocation6], 1 }
 0x517   :  { %2080 = vsyncpa [#allocation6 + $0x1], 1 }
 0x518   :  { %2081 = vsyncpa [#allocation9], 1 }
 0x519   :  { %2082 = vsyncpa [#allocation12], 1 }
 0x51a   :  { %2083 = vsyncpa [#allocation4], 1 }
 0x51b   :  { %2085 = vsyncpa [#allocation4 + $0x1], 1 }
 0x51c   :  { %2086 = vsyncpa [#allocation15], 1 }
 0x51d   :  { %2088 = vsyncpa [#allocation15 + $0x1], 1 }

</bundles_post_ra>
